<compile_context>
chip_gen: v7x
topology: tpu7x:2x2x1
jax: 0.10.0
libtpu: 0.0.40
codegen_flags: <defaults>
</compile_context>

<pallas_src>
import functools

import jax
import jax.numpy as jnp
from jax.experimental import pallas as pl
from jax.experimental.pallas import tpu as pltpu


# ----------------------------------------------------------------------------
# Fused kernel: stacked LSTM (wavefront) -> streamed attention -> output MLP.
# ----------------------------------------------------------------------------
def _make_fused_kernel(num_layers, T, B, H):
    def kernel(*refs):
        idx = 0
        x_ref = refs[idx]; idx += 1                    # (T*B, In) time-major flat
        wih0_ref = refs[idx]; idx += 1                 # (In, 4H)
        whh0_ref = refs[idx]; idx += 1                 # (H, 4H)
        b0_ref = refs[idx]; idx += 1                   # (1, 4H)
        upper_refs = []
        for _ in range(num_layers - 1):
            upper_refs.append((refs[idx], refs[idx + 1]))   # (2H, 4H), (1, 4H)
            idx += 2
        (wa1_ref, ba1_ref, wa2_ref, ba2_ref,
         wo1_ref, bo1_ref, wo2_ref, bo2_ref) = refs[idx:idx + 8]
        out_ref = refs[idx + 8]

        # Hoist all weight loads out of the unrolled recurrence.
        whh0 = whh0_ref[...]
        upper = [(w_ref[...], b_ref[...]) for (w_ref, b_ref) in upper_refs]
        wa1 = wa1_ref[...]                              # (H, 32)
        ba1 = ba1_ref[...]                              # (1, 32)
        wa2 = wa2_ref[...]                              # (1, 32)
        ba2 = ba2_ref[...]                              # (1, 1)

        # Layer-0 input projection for ALL timesteps: one MXU matmul, off the
        # serial critical path (depends only on x).
        xw0 = jnp.dot(x_ref[...], wih0_ref[...],
                      preferred_element_type=jnp.float32) + b0_ref[...]   # (T*B, 4H)

        def lstm_cell(gates, c_prev):
            # One full-vreg sigmoid + one full-vreg tanh (EUP), then static
            # lane slices in PyTorch gate order i, f, g, o.
            s = jax.nn.sigmoid(gates)
            tg = jnp.tanh(gates)
            i = s[:, 0 * H:1 * H]
            f = s[:, 1 * H:2 * H]
            g = tg[:, 2 * H:3 * H]
            o = s[:, 3 * H:4 * H]
            c = f * c_prev + i * g
            h = o * jnp.tanh(c)
            return h, c

        h_prev = [jnp.zeros((B, H), jnp.float32) for _ in range(num_layers)]
        c_prev = [jnp.zeros((B, H), jnp.float32) for _ in range(num_layers)]

        scores = []        # per-step (B, 1) attention logits (streamed)
        y_top = []         # per-step (B, H) top-layer hidden states (stay in vregs)

        for t in range(T):                              # fully unrolled (T static)
            # ---- layer 0: hoisted xw slice + recurrent matmul ----
            gates = xw0[t * B:(t + 1) * B, :] + jnp.dot(
                h_prev[0], whh0, preferred_element_type=jnp.float32)
            h0, c0 = lstm_cell(gates, c_prev[0])
            h_prev[0], c_prev[0] = h0, c0
            y = h0
            # ---- upper layers: fused input projection (one matmul / step) ----
            # Dependence DAG is a wavefront: layer-l step t only needs
            # layer-(l-1) step t and layer-l step t-1, so the scheduler can
            # overlap layer-(l-1) step t+1 with layer-l step t.
            for L in range(1, num_layers):
                wcat, bL = upper[L - 1]
                inp = jnp.concatenate([y, h_prev[L]], axis=-1)        # (B, 2H)
                gates = jnp.dot(inp, wcat,
                                preferred_element_type=jnp.float32) + bL
                hL, cL = lstm_cell(gates, c_prev[L])
                h_prev[L], c_prev[L] = hL, cL
                y = hL
            y_top.append(y)
            # ---- streamed attention score for timestep t (hides under the
            #      next step's MXU/EUP latency) ----
            a = jnp.tanh(jnp.dot(y, wa1,
                                 preferred_element_type=jnp.float32) + ba1)   # (B, 32)
            scores.append(jnp.sum(a * wa2, axis=-1, keepdims=True) + ba2)     # (B, 1)

        # ---------------- epilogue: softmax over T + weighted sum ------------
        m = scores[0]
        for t in range(1, T):
            m = jnp.maximum(m, scores[t])
        es = [jnp.exp(s - m) for s in scores]
        denom = es[0]
        for t in range(1, T):
            denom = denom + es[t]
        inv = pl.reciprocal(denom)                       # exact 1/x (f32)
        ctx = (es[0] * inv) * y_top[0]
        for t in range(1, T):
            ctx = ctx + (es[t] * inv) * y_top[t]         # (B, H)

        # ---------------- output MLP: linear -> relu -> linear ---------------
        h1 = jnp.maximum(
            jnp.dot(ctx, wo1_ref[...], preferred_element_type=jnp.float32)
            + bo1_ref[...], 0.0)                         # (B, 128)
        out_ref[...] = (jnp.dot(h1, wo2_ref[...],
                                preferred_element_type=jnp.float32)
                        + bo2_ref[...])                  # (B, out)

    return kernel


def lstm_model_forward(x, kp, hidden_size, output_size):
    # x: (B, T, input_size), batch_first like PyTorch.  The transpose+flatten
    # to time-major (T*B, In) is a single fused op inside the same jitted
    # program as the pallas_call (see jax.jit in __main__), not a separate
    # dispatch, and it removes all in-kernel reshapes/relayouts.
    B, T, input_size = x.shape
    x_flat = jnp.transpose(x, (1, 0, 2)).reshape(T * B, input_size)
    num_layers = len(kp["lstm"])

    args = [x_flat,
            kp["lstm"][0]["w_ih_t"], kp["lstm"][0]["w_hh_t"], kp["lstm"][0]["b"]]
    for L in range(1, num_layers):
        args += [kp["lstm"][L]["w_cat"], kp["lstm"][L]["b"]]
    args += [kp["wa1_t"], kp["ba1"], kp["wa2_row"], kp["ba2"],
             kp["wo1_t"], kp["bo1"], kp["wo2_t"], kp["bo2"]]

    kernel = _make_fused_kernel(num_layers, T, B, hidden_size)
    return pl.pallas_call(
        kernel,
        out_shape=jax.ShapeDtypeStruct((B, output_size), jnp.float32),
        in_specs=[pl.BlockSpec(memory_space=pltpu.MemorySpace.VMEM)] * len(args),
        out_specs=pl.BlockSpec(memory_space=pltpu.MemorySpace.VMEM),
    )(*args)


# ----------------------------------------------------------------------------
# Parameter init (deterministic, PyTorch-style uniform bounds) + layout prep.
# ----------------------------------------------------------------------------
def _uniform(key, shape, bound):
    return jax.random.uniform(key, shape, jnp.float32, -bound, bound)


def init_params(key, input_size, hidden_size, output_size, num_layers):
    raw = {"lstm": [], "attn": {}, "out": {}}
    keys = iter(jax.random.split(key, 4 * num_layers + 8))
    k_lstm = 1.0 / float(hidden_size) ** 0.5
    for layer in range(num_layers):
        in_sz = input_size if layer == 0 else hidden_size
        raw["lstm"].append(dict(
            w_ih=_uniform(next(keys), (4 * hidden_size, in_sz), k_lstm),
            w_hh=_uniform(next(keys), (4 * hidden_size, hidden_size), k_lstm),
            b_ih=_uniform(next(keys), (4 * hidden_size,), k_lstm),
            b_hh=_uniform(next(keys), (4 * hidden_size,), k_lstm)))
    k_a1 = 1.0 / float(hidden_size) ** 0.5
    raw["attn"]["w1"] = _uniform(next(keys), (32, hidden_size), k_a1)
    raw["attn"]["b1"] = _uniform(next(keys), (32,), k_a1)
    k_a2 = 1.0 / 32.0 ** 0.5
    raw["attn"]["w2"] = _uniform(next(keys), (1, 32), k_a2)
    raw["attn"]["b2"] = _uniform(next(keys), (1,), k_a2)
    k_o1 = 1.0 / float(hidden_size) ** 0.5
    raw["out"]["w1"] = _uniform(next(keys), (128, hidden_size), k_o1)
    raw["out"]["b1"] = _uniform(next(keys), (128,), k_o1)
    k_o2 = 1.0 / 128.0 ** 0.5
    raw["out"]["w2"] = _uniform(next(keys), (output_size, 128), k_o2)
    raw["out"]["b2"] = _uniform(next(keys), (output_size,), k_o2)
    return raw


def kernel_params(raw):
    """Pre-transpose / pre-concat weights into the layouts the fused kernel expects."""
    kp = {"lstm": []}
    for layer_idx, layer in enumerate(raw["lstm"]):
        b = (layer["b_ih"] + layer["b_hh"])[None, :]              # (1, 4H)
        if layer_idx == 0:
            kp["lstm"].append(dict(
                w_ih_t=layer["w_ih"].T,                           # (In, 4H)
                w_hh_t=layer["w_hh"].T,                           # (H, 4H)
                b=b))
        else:
            # Fused K: concat([y_t, h_{t-1}]) @ concat([W_ih^T, W_hh^T], 0)
            kp["lstm"].append(dict(
                w_cat=jnp.concatenate([layer["w_ih"].T, layer["w_hh"].T],
                                      axis=0),                    # (2H, 4H)
                b=b))
    kp["wa1_t"] = raw["attn"]["w1"].T                             # (H, 32)
    kp["ba1"] = raw["attn"]["b1"][None, :]                        # (1, 32)
    kp["wa2_row"] = raw["attn"]["w2"]                             # (1, 32)
    kp["ba2"] = raw["attn"]["b2"][None, :]                        # (1, 1)
    kp["wo1_t"] = raw["out"]["w1"].T                              # (H, 128)
    kp["bo1"] = raw["out"]["b1"][None, :]                         # (1, 128)
    kp["wo2_t"] = raw["out"]["w2"].T                              # (128, out)
    kp["bo2"] = raw["out"]["b2"][None, :]                         # (1, out)
    return kp


def reference_forward(x, raw):
    """Pure-JAX reference matching the PyTorch forward semantics."""
    B, T, _ = x.shape
    h_seq = x
    for layer in raw["lstm"]:
        H = layer["w_hh"].shape[1]
        h = jnp.zeros((B, H), jnp.float32)
        c = jnp.zeros((B, H), jnp.float32)
        outs = []
        for t in range(T):
            gates = (h_seq[:, t, :] @ layer["w_ih"].T + h @ layer["w_hh"].T
                     + layer["b_ih"] + layer["b_hh"])
            i = jax.nn.sigmoid(gates[:, 0 * H:1 * H])
            f = jax.nn.sigmoid(gates[:, 1 * H:2 * H])
            g = jnp.tanh(gates[:, 2 * H:3 * H])
            o = jax.nn.sigmoid(gates[:, 3 * H:4 * H])
            c = f * c + i * g
            h = o * jnp.tanh(c)
            outs.append(h)
        h_seq = jnp.stack(outs, axis=1)
    s = jnp.tanh(h_seq @ raw["attn"]["w1"].T + raw["attn"]["b1"]) @ raw["attn"]["w2"].T \
        + raw["attn"]["b2"]                                       # (B, T, 1)
    w = jax.nn.softmax(s, axis=1)[..., 0]                         # (B, T)
    ctx = jnp.sum(w[..., None] * h_seq, axis=1)                   # (B, H)
    h1 = jnp.maximum(ctx @ raw["out"]["w1"].T + raw["out"]["b1"], 0.0)
    return h1 @ raw["out"]["w2"].T + raw["out"]["b2"]


if __name__ == "__main__":
    B, T = 2, 8
    input_size, hidden_size, output_size, num_layer = 16, 32, 4, 2

    key = jax.random.PRNGKey(0)
    kx, kp_key = jax.random.split(key)
    x = jax.random.normal(kx, (B, T, input_size), jnp.float32)

    raw = init_params(kp_key, input_size, hidden_size, output_size, num_layer)
    kp = kernel_params(raw)

    # Single jitted program: the x transpose/flatten fuses with the pallas_call
    # (no separate host-side dispatch for the layout change).
    forward = jax.jit(lstm_model_forward, static_argnums=(2, 3))
    out = jax.block_until_ready(forward(x, kp, hidden_size, output_size))

    ref = reference_forward(x, raw)
    assert out.shape == (B, output_size)
    assert jnp.allclose(out, ref, atol=2e-4, rtol=2e-4), (out, ref)

    print("KERNEL_OK")
</pallas_src>

<mosaic_0001>
module attributes {stable_mosaic.version = 11 : i64} {
  func.func @kernel(%arg0: memref<16x16xf32, #tpu.memory_space<vmem>>, %arg1: memref<16x128xf32, #tpu.memory_space<vmem>>, %arg2: memref<32x128xf32, #tpu.memory_space<vmem>>, %arg3: memref<1x128xf32, #tpu.memory_space<vmem>>, %arg4: memref<64x128xf32, #tpu.memory_space<vmem>>, %arg5: memref<1x128xf32, #tpu.memory_space<vmem>>, %arg6: memref<32x32xf32, #tpu.memory_space<vmem>>, %arg7: memref<1x32xf32, #tpu.memory_space<vmem>>, %arg8: memref<1x32xf32, #tpu.memory_space<vmem>>, %arg9: memref<1x1xf32, #tpu.memory_space<vmem>>, %arg10: memref<32x128xf32, #tpu.memory_space<vmem>>, %arg11: memref<1x128xf32, #tpu.memory_space<vmem>>, %arg12: memref<128x4xf32, #tpu.memory_space<vmem>>, %arg13: memref<1x4xf32, #tpu.memory_space<vmem>>, %arg14: memref<2x4xf32, #tpu.memory_space<vmem>>) attributes {dimension_semantics = [], scalar_prefetch = 0 : i64, scratch_operands = 0 : i64, tpu.core_type = #tpu.core_type<tc>} {
    %c0 = arith.constant 0 : index
    %c0_0 = arith.constant 0 : index
    %0 = vector.load %arg2[%c0, %c0_0] : memref<32x128xf32, #tpu.memory_space<vmem>>, vector<32x128xf32>
    %c0_1 = arith.constant 0 : index
    %c0_2 = arith.constant 0 : index
    %1 = vector.load %arg4[%c0_1, %c0_2] : memref<64x128xf32, #tpu.memory_space<vmem>>, vector<64x128xf32>
    %c0_3 = arith.constant 0 : index
    %c0_4 = arith.constant 0 : index
    %2 = vector.load %arg5[%c0_3, %c0_4] : memref<1x128xf32, #tpu.memory_space<vmem>>, vector<1x128xf32>
    %c0_5 = arith.constant 0 : index
    %c0_6 = arith.constant 0 : index
    %3 = vector.load %arg6[%c0_5, %c0_6] : memref<32x32xf32, #tpu.memory_space<vmem>>, vector<32x32xf32>
    %c0_7 = arith.constant 0 : index
    %c0_8 = arith.constant 0 : index
    %4 = vector.load %arg7[%c0_7, %c0_8] : memref<1x32xf32, #tpu.memory_space<vmem>>, vector<1x32xf32>
    %c0_9 = arith.constant 0 : index
    %c0_10 = arith.constant 0 : index
    %5 = vector.load %arg8[%c0_9, %c0_10] : memref<1x32xf32, #tpu.memory_space<vmem>>, vector<1x32xf32>
    %c0_11 = arith.constant 0 : index
    %c0_12 = arith.constant 0 : index
    %6 = vector.load %arg9[%c0_11, %c0_12] : memref<1x1xf32, #tpu.memory_space<vmem>>, vector<1x1xf32>
    %c0_13 = arith.constant 0 : index
    %c0_14 = arith.constant 0 : index
    %7 = vector.load %arg0[%c0_13, %c0_14] : memref<16x16xf32, #tpu.memory_space<vmem>>, vector<16x16xf32>
    %c0_15 = arith.constant 0 : index
    %c0_16 = arith.constant 0 : index
    %8 = vector.load %arg1[%c0_15, %c0_16] : memref<16x128xf32, #tpu.memory_space<vmem>>, vector<16x128xf32>
    %cst = arith.constant dense<0.000000e+00> : vector<16x128xf32>
    %9 = tpu.matmul %7, %8, %cst {dimension_numbers = #tpu.dot_dimension_numbers<[1], [0], [0], [1], [0, 0, 1, 1], [], []>} : vector<16x16xf32>, vector<16x128xf32>, vector<16x128xf32> -> vector<16x128xf32>
    %c0_17 = arith.constant 0 : index
    %c0_18 = arith.constant 0 : index
    %10 = vector.load %arg3[%c0_17, %c0_18] : memref<1x128xf32, #tpu.memory_space<vmem>>, vector<1x128xf32>
    %11 = vector.broadcast %10 : vector<1x128xf32> to vector<16x128xf32>
    %12 = arith.addf %9, %11 : vector<16x128xf32>
    %cst_19 = arith.constant 0.000000e+00 : f32
    %13 = vector.broadcast %cst_19 : f32 to vector<2x32xf32>
    %cst_20 = arith.constant 0.000000e+00 : f32
    %14 = vector.broadcast %cst_20 : f32 to vector<2x32xf32>
    %cst_21 = arith.constant 0.000000e+00 : f32
    %15 = vector.broadcast %cst_21 : f32 to vector<2x32xf32>
    %cst_22 = arith.constant 0.000000e+00 : f32
    %16 = vector.broadcast %cst_22 : f32 to vector<2x32xf32>
    %17 = vector.extract_strided_slice %12 {offsets = [0, 0], sizes = [2, 128], strides = [1, 1]} : vector<16x128xf32> to vector<2x128xf32>
    %cst_23 = arith.constant dense<0.000000e+00> : vector<2x128xf32>
    %18 = tpu.matmul %13, %0, %cst_23 {dimension_numbers = #tpu.dot_dimension_numbers<[1], [0], [0], [1], [0, 0, 1, 1], [], []>} : vector<2x32xf32>, vector<32x128xf32>, vector<2x128xf32> -> vector<2x128xf32>
    %19 = arith.addf %17, %18 : vector<2x128xf32>
    %20 = arith.negf %19 : vector<2x128xf32>
    %21 = math.exp %20 : vector<2x128xf32>
    %cst_24 = arith.constant 1.000000e+00 : f32
    %22 = vector.broadcast %cst_24 : f32 to vector<2x128xf32>
    %23 = arith.addf %22, %21 : vector<2x128xf32>
    %24 = arith.divf %22, %23 : vector<2x128xf32>
    %25 = math.tanh %19 : vector<2x128xf32>
    %26 = vector.extract_strided_slice %24 {offsets = [0, 0], sizes = [2, 32], strides = [1, 1]} : vector<2x128xf32> to vector<2x32xf32>
    %27 = vector.extract_strided_slice %24 {offsets = [0, 32], sizes = [2, 32], strides = [1, 1]} : vector<2x128xf32> to vector<2x32xf32>
    %28 = vector.extract_strided_slice %25 {offsets = [0, 64], sizes = [2, 32], strides = [1, 1]} : vector<2x128xf32> to vector<2x32xf32>
    %29 = vector.extract_strided_slice %24 {offsets = [0, 96], sizes = [2, 32], strides = [1, 1]} : vector<2x128xf32> to vector<2x32xf32>
    %30 = arith.mulf %27, %15 : vector<2x32xf32>
    %31 = arith.mulf %26, %28 : vector<2x32xf32>
    %32 = arith.addf %30, %31 : vector<2x32xf32>
    %33 = math.tanh %32 : vector<2x32xf32>
    %34 = arith.mulf %29, %33 : vector<2x32xf32>
    %35 = tpu.concatenate %34, %14 in 1 : vector<2x32xf32>, vector<2x32xf32> -> vector<2x64xf32>
    %cst_25 = arith.constant dense<0.000000e+00> : vector<2x128xf32>
    %36 = tpu.matmul %35, %1, %cst_25 {dimension_numbers = #tpu.dot_dimension_numbers<[1], [0], [0], [1], [0, 0, 1, 1], [], []>} : vector<2x64xf32>, vector<64x128xf32>, vector<2x128xf32> -> vector<2x128xf32>
    %37 = vector.broadcast %2 : vector<1x128xf32> to vector<2x128xf32>
    %38 = arith.addf %36, %37 : vector<2x128xf32>
    %39 = arith.negf %38 : vector<2x128xf32>
    %40 = math.exp %39 : vector<2x128xf32>
    %cst_26 = arith.constant 1.000000e+00 : f32
    %41 = vector.broadcast %cst_26 : f32 to vector<2x128xf32>
    %42 = arith.addf %41, %40 : vector<2x128xf32>
    %43 = arith.divf %41, %42 : vector<2x128xf32>
    %44 = math.tanh %38 : vector<2x128xf32>
    %45 = vector.extract_strided_slice %43 {offsets = [0, 0], sizes = [2, 32], strides = [1, 1]} : vector<2x128xf32> to vector<2x32xf32>
    %46 = vector.extract_strided_slice %43 {offsets = [0, 32], sizes = [2, 32], strides = [1, 1]} : vector<2x128xf32> to vector<2x32xf32>
    %47 = vector.extract_strided_slice %44 {offsets = [0, 64], sizes = [2, 32], strides = [1, 1]} : vector<2x128xf32> to vector<2x32xf32>
    %48 = vector.extract_strided_slice %43 {offsets = [0, 96], sizes = [2, 32], strides = [1, 1]} : vector<2x128xf32> to vector<2x32xf32>
    %49 = arith.mulf %46, %16 : vector<2x32xf32>
    %50 = arith.mulf %45, %47 : vector<2x32xf32>
    %51 = arith.addf %49, %50 : vector<2x32xf32>
    %52 = math.tanh %51 : vector<2x32xf32>
    %53 = arith.mulf %48, %52 : vector<2x32xf32>
    %cst_27 = arith.constant dense<0.000000e+00> : vector<2x32xf32>
    %54 = tpu.matmul %53, %3, %cst_27 {dimension_numbers = #tpu.dot_dimension_numbers<[1], [0], [0], [1], [0, 0, 1, 1], [], []>} : vector<2x32xf32>, vector<32x32xf32>, vector<2x32xf32> -> vector<2x32xf32>
    %55 = vector.broadcast %4 : vector<1x32xf32> to vector<2x32xf32>
    %56 = arith.addf %54, %55 : vector<2x32xf32>
    %57 = math.tanh %56 : vector<2x32xf32>
    %58 = vector.broadcast %5 : vector<1x32xf32> to vector<2x32xf32>
    %59 = arith.mulf %57, %58 : vector<2x32xf32>
    %cst_28 = arith.constant dense<0.000000e+00> : vector<2xf32>
    %60 = vector.multi_reduction <add>, %59, %cst_28 [1] : vector<2x32xf32> to vector<2xf32>
    %61 = vector.shape_cast %60 : vector<2xf32> to vector<2x1xf32>
    %62 = vector.broadcast %6 : vector<1x1xf32> to vector<2x1xf32>
    %63 = arith.addf %61, %62 : vector<2x1xf32>
    %64 = vector.extract_strided_slice %12 {offsets = [2, 0], sizes = [2, 128], strides = [1, 1]} : vector<16x128xf32> to vector<2x128xf32>
    %cst_29 = arith.constant dense<0.000000e+00> : vector<2x128xf32>
    %65 = tpu.matmul %34, %0, %cst_29 {dimension_numbers = #tpu.dot_dimension_numbers<[1], [0], [0], [1], [0, 0, 1, 1], [], []>} : vector<2x32xf32>, vector<32x128xf32>, vector<2x128xf32> -> vector<2x128xf32>
    %66 = arith.addf %64, %65 : vector<2x128xf32>
    %67 = arith.negf %66 : vector<2x128xf32>
    %68 = math.exp %67 : vector<2x128xf32>
    %cst_30 = arith.constant 1.000000e+00 : f32
    %69 = vector.broadcast %cst_30 : f32 to vector<2x128xf32>
    %70 = arith.addf %69, %68 : vector<2x128xf32>
    %71 = arith.divf %69, %70 : vector<2x128xf32>
    %72 = math.tanh %66 : vector<2x128xf32>
    %73 = vector.extract_strided_slice %71 {offsets = [0, 0], sizes = [2, 32], strides = [1, 1]} : vector<2x128xf32> to vector<2x32xf32>
    %74 = vector.extract_strided_slice %71 {offsets = [0, 32], sizes = [2, 32], strides = [1, 1]} : vector<2x128xf32> to vector<2x32xf32>
    %75 = vector.extract_strided_slice %72 {offsets = [0, 64], sizes = [2, 32], strides = [1, 1]} : vector<2x128xf32> to vector<2x32xf32>
    %76 = vector.extract_strided_slice %71 {offsets = [0, 96], sizes = [2, 32], strides = [1, 1]} : vector<2x128xf32> to vector<2x32xf32>
    %77 = arith.mulf %74, %32 : vector<2x32xf32>
    %78 = arith.mulf %73, %75 : vector<2x32xf32>
    %79 = arith.addf %77, %78 : vector<2x32xf32>
    %80 = math.tanh %79 : vector<2x32xf32>
    %81 = arith.mulf %76, %80 : vector<2x32xf32>
    %82 = tpu.concatenate %81, %53 in 1 : vector<2x32xf32>, vector<2x32xf32> -> vector<2x64xf32>
    %cst_31 = arith.constant dense<0.000000e+00> : vector<2x128xf32>
    %83 = tpu.matmul %82, %1, %cst_31 {dimension_numbers = #tpu.dot_dimension_numbers<[1], [0], [0], [1], [0, 0, 1, 1], [], []>} : vector<2x64xf32>, vector<64x128xf32>, vector<2x128xf32> -> vector<2x128xf32>
    %84 = vector.broadcast %2 : vector<1x128xf32> to vector<2x128xf32>
    %85 = arith.addf %83, %84 : vector<2x128xf32>
    %86 = arith.negf %85 : vector<2x128xf32>
    %87 = math.exp %86 : vector<2x128xf32>
    %cst_32 = arith.constant 1.000000e+00 : f32
    %88 = vector.broadcast %cst_32 : f32 to vector<2x128xf32>
    %89 = arith.addf %88, %87 : vector<2x128xf32>
    %90 = arith.divf %88, %89 : vector<2x128xf32>
    %91 = math.tanh %85 : vector<2x128xf32>
    %92 = vector.extract_strided_slice %90 {offsets = [0, 0], sizes = [2, 32], strides = [1, 1]} : vector<2x128xf32> to vector<2x32xf32>
    %93 = vector.extract_strided_slice %90 {offsets = [0, 32], sizes = [2, 32], strides = [1, 1]} : vector<2x128xf32> to vector<2x32xf32>
    %94 = vector.extract_strided_slice %91 {offsets = [0, 64], sizes = [2, 32], strides = [1, 1]} : vector<2x128xf32> to vector<2x32xf32>
    %95 = vector.extract_strided_slice %90 {offsets = [0, 96], sizes = [2, 32], strides = [1, 1]} : vector<2x128xf32> to vector<2x32xf32>
    %96 = arith.mulf %93, %51 : vector<2x32xf32>
    %97 = arith.mulf %92, %94 : vector<2x32xf32>
    %98 = arith.addf %96, %97 : vector<2x32xf32>
    %99 = math.tanh %98 : vector<2x32xf32>
    %100 = arith.mulf %95, %99 : vector<2x32xf32>
    %cst_33 = arith.constant dense<0.000000e+00> : vector<2x32xf32>
    %101 = tpu.matmul %100, %3, %cst_33 {dimension_numbers = #tpu.dot_dimension_numbers<[1], [0], [0], [1], [0, 0, 1, 1], [], []>} : vector<2x32xf32>, vector<32x32xf32>, vector<2x32xf32> -> vector<2x32xf32>
    %102 = vector.broadcast %4 : vector<1x32xf32> to vector<2x32xf32>
    %103 = arith.addf %101, %102 : vector<2x32xf32>
    %104 = math.tanh %103 : vector<2x32xf32>
    %105 = vector.broadcast %5 : vector<1x32xf32> to vector<2x32xf32>
    %106 = arith.mulf %104, %105 : vector<2x32xf32>
    %cst_34 = arith.constant dense<0.000000e+00> : vector<2xf32>
    %107 = vector.multi_reduction <add>, %106, %cst_34 [1] : vector<2x32xf32> to vector<2xf32>
    %108 = vector.shape_cast %107 : vector<2xf32> to vector<2x1xf32>
    %109 = vector.broadcast %6 : vector<1x1xf32> to vector<2x1xf32>
    %110 = arith.addf %108, %109 : vector<2x1xf32>
    %111 = vector.extract_strided_slice %12 {offsets = [4, 0], sizes = [2, 128], strides = [1, 1]} : vector<16x128xf32> to vector<2x128xf32>
    %cst_35 = arith.constant dense<0.000000e+00> : vector<2x128xf32>
    %112 = tpu.matmul %81, %0, %cst_35 {dimension_numbers = #tpu.dot_dimension_numbers<[1], [0], [0], [1], [0, 0, 1, 1], [], []>} : vector<2x32xf32>, vector<32x128xf32>, vector<2x128xf32> -> vector<2x128xf32>
    %113 = arith.addf %111, %112 : vector<2x128xf32>
    %114 = arith.negf %113 : vector<2x128xf32>
    %115 = math.exp %114 : vector<2x128xf32>
    %cst_36 = arith.constant 1.000000e+00 : f32
    %116 = vector.broadcast %cst_36 : f32 to vector<2x128xf32>
    %117 = arith.addf %116, %115 : vector<2x128xf32>
    %118 = arith.divf %116, %117 : vector<2x128xf32>
    %119 = math.tanh %113 : vector<2x128xf32>
    %120 = vector.extract_strided_slice %118 {offsets = [0, 0], sizes = [2, 32], strides = [1, 1]} : vector<2x128xf32> to vector<2x32xf32>
    %121 = vector.extract_strided_slice %118 {offsets = [0, 32], sizes = [2, 32], strides = [1, 1]} : vector<2x128xf32> to vector<2x32xf32>
    %122 = vector.extract_strided_slice %119 {offsets = [0, 64], sizes = [2, 32], strides = [1, 1]} : vector<2x128xf32> to vector<2x32xf32>
    %123 = vector.extract_strided_slice %118 {offsets = [0, 96], sizes = [2, 32], strides = [1, 1]} : vector<2x128xf32> to vector<2x32xf32>
    %124 = arith.mulf %121, %79 : vector<2x32xf32>
    %125 = arith.mulf %120, %122 : vector<2x32xf32>
    %126 = arith.addf %124, %125 : vector<2x32xf32>
    %127 = math.tanh %126 : vector<2x32xf32>
    %128 = arith.mulf %123, %127 : vector<2x32xf32>
    %129 = tpu.concatenate %128, %100 in 1 : vector<2x32xf32>, vector<2x32xf32> -> vector<2x64xf32>
    %cst_37 = arith.constant dense<0.000000e+00> : vector<2x128xf32>
    %130 = tpu.matmul %129, %1, %cst_37 {dimension_numbers = #tpu.dot_dimension_numbers<[1], [0], [0], [1], [0, 0, 1, 1], [], []>} : vector<2x64xf32>, vector<64x128xf32>, vector<2x128xf32> -> vector<2x128xf32>
    %131 = vector.broadcast %2 : vector<1x128xf32> to vector<2x128xf32>
    %132 = arith.addf %130, %131 : vector<2x128xf32>
    %133 = arith.negf %132 : vector<2x128xf32>
    %134 = math.exp %133 : vector<2x128xf32>
    %cst_38 = arith.constant 1.000000e+00 : f32
    %135 = vector.broadcast %cst_38 : f32 to vector<2x128xf32>
    %136 = arith.addf %135, %134 : vector<2x128xf32>
    %137 = arith.divf %135, %136 : vector<2x128xf32>
    %138 = math.tanh %132 : vector<2x128xf32>
    %139 = vector.extract_strided_slice %137 {offsets = [0, 0], sizes = [2, 32], strides = [1, 1]} : vector<2x128xf32> to vector<2x32xf32>
    %140 = vector.extract_strided_slice %137 {offsets = [0, 32], sizes = [2, 32], strides = [1, 1]} : vector<2x128xf32> to vector<2x32xf32>
    %141 = vector.extract_strided_slice %138 {offsets = [0, 64], sizes = [2, 32], strides = [1, 1]} : vector<2x128xf32> to vector<2x32xf32>
    %142 = vector.extract_strided_slice %137 {offsets = [0, 96], sizes = [2, 32], strides = [1, 1]} : vector<2x128xf32> to vector<2x32xf32>
    %143 = arith.mulf %140, %98 : vector<2x32xf32>
    %144 = arith.mulf %139, %141 : vector<2x32xf32>
    %145 = arith.addf %143, %144 : vector<2x32xf32>
    %146 = math.tanh %145 : vector<2x32xf32>
    %147 = arith.mulf %142, %146 : vector<2x32xf32>
    %cst_39 = arith.constant dense<0.000000e+00> : vector<2x32xf32>
    %148 = tpu.matmul %147, %3, %cst_39 {dimension_numbers = #tpu.dot_dimension_numbers<[1], [0], [0], [1], [0, 0, 1, 1], [], []>} : vector<2x32xf32>, vector<32x32xf32>, vector<2x32xf32> -> vector<2x32xf32>
    %149 = vector.broadcast %4 : vector<1x32xf32> to vector<2x32xf32>
    %150 = arith.addf %148, %149 : vector<2x32xf32>
    %151 = math.tanh %150 : vector<2x32xf32>
    %152 = vector.broadcast %5 : vector<1x32xf32> to vector<2x32xf32>
    %153 = arith.mulf %151, %152 : vector<2x32xf32>
    %cst_40 = arith.constant dense<0.000000e+00> : vector<2xf32>
    %154 = vector.multi_reduction <add>, %153, %cst_40 [1] : vector<2x32xf32> to vector<2xf32>
    %155 = vector.shape_cast %154 : vector<2xf32> to vector<2x1xf32>
    %156 = vector.broadcast %6 : vector<1x1xf32> to vector<2x1xf32>
    %157 = arith.addf %155, %156 : vector<2x1xf32>
    %158 = vector.extract_strided_slice %12 {offsets = [6, 0], sizes = [2, 128], strides = [1, 1]} : vector<16x128xf32> to vector<2x128xf32>
    %cst_41 = arith.constant dense<0.000000e+00> : vector<2x128xf32>
    %159 = tpu.matmul %128, %0, %cst_41 {dimension_numbers = #tpu.dot_dimension_numbers<[1], [0], [0], [1], [0, 0, 1, 1], [], []>} : vector<2x32xf32>, vector<32x128xf32>, vector<2x128xf32> -> vector<2x128xf32>
    %160 = arith.addf %158, %159 : vector<2x128xf32>
    %161 = arith.negf %160 : vector<2x128xf32>
    %162 = math.exp %161 : vector<2x128xf32>
    %cst_42 = arith.constant 1.000000e+00 : f32
    %163 = vector.broadcast %cst_42 : f32 to vector<2x128xf32>
    %164 = arith.addf %163, %162 : vector<2x128xf32>
    %165 = arith.divf %163, %164 : vector<2x128xf32>
    %166 = math.tanh %160 : vector<2x128xf32>
    %167 = vector.extract_strided_slice %165 {offsets = [0, 0], sizes = [2, 32], strides = [1, 1]} : vector<2x128xf32> to vector<2x32xf32>
    %168 = vector.extract_strided_slice %165 {offsets = [0, 32], sizes = [2, 32], strides = [1, 1]} : vector<2x128xf32> to vector<2x32xf32>
    %169 = vector.extract_strided_slice %166 {offsets = [0, 64], sizes = [2, 32], strides = [1, 1]} : vector<2x128xf32> to vector<2x32xf32>
    %170 = vector.extract_strided_slice %165 {offsets = [0, 96], sizes = [2, 32], strides = [1, 1]} : vector<2x128xf32> to vector<2x32xf32>
    %171 = arith.mulf %168, %126 : vector<2x32xf32>
    %172 = arith.mulf %167, %169 : vector<2x32xf32>
    %173 = arith.addf %171, %172 : vector<2x32xf32>
    %174 = math.tanh %173 : vector<2x32xf32>
    %175 = arith.mulf %170, %174 : vector<2x32xf32>
    %176 = tpu.concatenate %175, %147 in 1 : vector<2x32xf32>, vector<2x32xf32> -> vector<2x64xf32>
    %cst_43 = arith.constant dense<0.000000e+00> : vector<2x128xf32>
    %177 = tpu.matmul %176, %1, %cst_43 {dimension_numbers = #tpu.dot_dimension_numbers<[1], [0], [0], [1], [0, 0, 1, 1], [], []>} : vector<2x64xf32>, vector<64x128xf32>, vector<2x128xf32> -> vector<2x128xf32>
    %178 = vector.broadcast %2 : vector<1x128xf32> to vector<2x128xf32>
    %179 = arith.addf %177, %178 : vector<2x128xf32>
    %180 = arith.negf %179 : vector<2x128xf32>
    %181 = math.exp %180 : vector<2x128xf32>
    %cst_44 = arith.constant 1.000000e+00 : f32
    %182 = vector.broadcast %cst_44 : f32 to vector<2x128xf32>
    %183 = arith.addf %182, %181 : vector<2x128xf32>
    %184 = arith.divf %182, %183 : vector<2x128xf32>
    %185 = math.tanh %179 : vector<2x128xf32>
    %186 = vector.extract_strided_slice %184 {offsets = [0, 0], sizes = [2, 32], strides = [1, 1]} : vector<2x128xf32> to vector<2x32xf32>
    %187 = vector.extract_strided_slice %184 {offsets = [0, 32], sizes = [2, 32], strides = [1, 1]} : vector<2x128xf32> to vector<2x32xf32>
    %188 = vector.extract_strided_slice %185 {offsets = [0, 64], sizes = [2, 32], strides = [1, 1]} : vector<2x128xf32> to vector<2x32xf32>
    %189 = vector.extract_strided_slice %184 {offsets = [0, 96], sizes = [2, 32], strides = [1, 1]} : vector<2x128xf32> to vector<2x32xf32>
    %190 = arith.mulf %187, %145 : vector<2x32xf32>
    %191 = arith.mulf %186, %188 : vector<2x32xf32>
    %192 = arith.addf %190, %191 : vector<2x32xf32>
    %193 = math.tanh %192 : vector<2x32xf32>
    %194 = arith.mulf %189, %193 : vector<2x32xf32>
    %cst_45 = arith.constant dense<0.000000e+00> : vector<2x32xf32>
    %195 = tpu.matmul %194, %3, %cst_45 {dimension_numbers = #tpu.dot_dimension_numbers<[1], [0], [0], [1], [0, 0, 1, 1], [], []>} : vector<2x32xf32>, vector<32x32xf32>, vector<2x32xf32> -> vector<2x32xf32>
    %196 = vector.broadcast %4 : vector<1x32xf32> to vector<2x32xf32>
    %197 = arith.addf %195, %196 : vector<2x32xf32>
    %198 = math.tanh %197 : vector<2x32xf32>
    %199 = vector.broadcast %5 : vector<1x32xf32> to vector<2x32xf32>
    %200 = arith.mulf %198, %199 : vector<2x32xf32>
    %cst_46 = arith.constant dense<0.000000e+00> : vector<2xf32>
    %201 = vector.multi_reduction <add>, %200, %cst_46 [1] : vector<2x32xf32> to vector<2xf32>
    %202 = vector.shape_cast %201 : vector<2xf32> to vector<2x1xf32>
    %203 = vector.broadcast %6 : vector<1x1xf32> to vector<2x1xf32>
    %204 = arith.addf %202, %203 : vector<2x1xf32>
    %205 = vector.extract_strided_slice %12 {offsets = [8, 0], sizes = [2, 128], strides = [1, 1]} : vector<16x128xf32> to vector<2x128xf32>
    %cst_47 = arith.constant dense<0.000000e+00> : vector<2x128xf32>
    %206 = tpu.matmul %175, %0, %cst_47 {dimension_numbers = #tpu.dot_dimension_numbers<[1], [0], [0], [1], [0, 0, 1, 1], [], []>} : vector<2x32xf32>, vector<32x128xf32>, vector<2x128xf32> -> vector<2x128xf32>
    %207 = arith.addf %205, %206 : vector<2x128xf32>
    %208 = arith.negf %207 : vector<2x128xf32>
    %209 = math.exp %208 : vector<2x128xf32>
    %cst_48 = arith.constant 1.000000e+00 : f32
    %210 = vector.broadcast %cst_48 : f32 to vector<2x128xf32>
    %211 = arith.addf %210, %209 : vector<2x128xf32>
    %212 = arith.divf %210, %211 : vector<2x128xf32>
    %213 = math.tanh %207 : vector<2x128xf32>
    %214 = vector.extract_strided_slice %212 {offsets = [0, 0], sizes = [2, 32], strides = [1, 1]} : vector<2x128xf32> to vector<2x32xf32>
    %215 = vector.extract_strided_slice %212 {offsets = [0, 32], sizes = [2, 32], strides = [1, 1]} : vector<2x128xf32> to vector<2x32xf32>
    %216 = vector.extract_strided_slice %213 {offsets = [0, 64], sizes = [2, 32], strides = [1, 1]} : vector<2x128xf32> to vector<2x32xf32>
    %217 = vector.extract_strided_slice %212 {offsets = [0, 96], sizes = [2, 32], strides = [1, 1]} : vector<2x128xf32> to vector<2x32xf32>
    %218 = arith.mulf %215, %173 : vector<2x32xf32>
    %219 = arith.mulf %214, %216 : vector<2x32xf32>
    %220 = arith.addf %218, %219 : vector<2x32xf32>
    %221 = math.tanh %220 : vector<2x32xf32>
    %222 = arith.mulf %217, %221 : vector<2x32xf32>
    %223 = tpu.concatenate %222, %194 in 1 : vector<2x32xf32>, vector<2x32xf32> -> vector<2x64xf32>
    %cst_49 = arith.constant dense<0.000000e+00> : vector<2x128xf32>
    %224 = tpu.matmul %223, %1, %cst_49 {dimension_numbers = #tpu.dot_dimension_numbers<[1], [0], [0], [1], [0, 0, 1, 1], [], []>} : vector<2x64xf32>, vector<64x128xf32>, vector<2x128xf32> -> vector<2x128xf32>
    %225 = vector.broadcast %2 : vector<1x128xf32> to vector<2x128xf32>
    %226 = arith.addf %224, %225 : vector<2x128xf32>
    %227 = arith.negf %226 : vector<2x128xf32>
    %228 = math.exp %227 : vector<2x128xf32>
    %cst_50 = arith.constant 1.000000e+00 : f32
    %229 = vector.broadcast %cst_50 : f32 to vector<2x128xf32>
    %230 = arith.addf %229, %228 : vector<2x128xf32>
    %231 = arith.divf %229, %230 : vector<2x128xf32>
    %232 = math.tanh %226 : vector<2x128xf32>
    %233 = vector.extract_strided_slice %231 {offsets = [0, 0], sizes = [2, 32], strides = [1, 1]} : vector<2x128xf32> to vector<2x32xf32>
    %234 = vector.extract_strided_slice %231 {offsets = [0, 32], sizes = [2, 32], strides = [1, 1]} : vector<2x128xf32> to vector<2x32xf32>
    %235 = vector.extract_strided_slice %232 {offsets = [0, 64], sizes = [2, 32], strides = [1, 1]} : vector<2x128xf32> to vector<2x32xf32>
    %236 = vector.extract_strided_slice %231 {offsets = [0, 96], sizes = [2, 32], strides = [1, 1]} : vector<2x128xf32> to vector<2x32xf32>
    %237 = arith.mulf %234, %192 : vector<2x32xf32>
    %238 = arith.mulf %233, %235 : vector<2x32xf32>
    %239 = arith.addf %237, %238 : vector<2x32xf32>
    %240 = math.tanh %239 : vector<2x32xf32>
    %241 = arith.mulf %236, %240 : vector<2x32xf32>
    %cst_51 = arith.constant dense<0.000000e+00> : vector<2x32xf32>
    %242 = tpu.matmul %241, %3, %cst_51 {dimension_numbers = #tpu.dot_dimension_numbers<[1], [0], [0], [1], [0, 0, 1, 1], [], []>} : vector<2x32xf32>, vector<32x32xf32>, vector<2x32xf32> -> vector<2x32xf32>
    %243 = vector.broadcast %4 : vector<1x32xf32> to vector<2x32xf32>
    %244 = arith.addf %242, %243 : vector<2x32xf32>
    %245 = math.tanh %244 : vector<2x32xf32>
    %246 = vector.broadcast %5 : vector<1x32xf32> to vector<2x32xf32>
    %247 = arith.mulf %245, %246 : vector<2x32xf32>
    %cst_52 = arith.constant dense<0.000000e+00> : vector<2xf32>
    %248 = vector.multi_reduction <add>, %247, %cst_52 [1] : vector<2x32xf32> to vector<2xf32>
    %249 = vector.shape_cast %248 : vector<2xf32> to vector<2x1xf32>
    %250 = vector.broadcast %6 : vector<1x1xf32> to vector<2x1xf32>
    %251 = arith.addf %249, %250 : vector<2x1xf32>
    %252 = vector.extract_strided_slice %12 {offsets = [10, 0], sizes = [2, 128], strides = [1, 1]} : vector<16x128xf32> to vector<2x128xf32>
    %cst_53 = arith.constant dense<0.000000e+00> : vector<2x128xf32>
    %253 = tpu.matmul %222, %0, %cst_53 {dimension_numbers = #tpu.dot_dimension_numbers<[1], [0], [0], [1], [0, 0, 1, 1], [], []>} : vector<2x32xf32>, vector<32x128xf32>, vector<2x128xf32> -> vector<2x128xf32>
    %254 = arith.addf %252, %253 : vector<2x128xf32>
    %255 = arith.negf %254 : vector<2x128xf32>
    %256 = math.exp %255 : vector<2x128xf32>
    %cst_54 = arith.constant 1.000000e+00 : f32
    %257 = vector.broadcast %cst_54 : f32 to vector<2x128xf32>
    %258 = arith.addf %257, %256 : vector<2x128xf32>
    %259 = arith.divf %257, %258 : vector<2x128xf32>
    %260 = math.tanh %254 : vector<2x128xf32>
    %261 = vector.extract_strided_slice %259 {offsets = [0, 0], sizes = [2, 32], strides = [1, 1]} : vector<2x128xf32> to vector<2x32xf32>
    %262 = vector.extract_strided_slice %259 {offsets = [0, 32], sizes = [2, 32], strides = [1, 1]} : vector<2x128xf32> to vector<2x32xf32>
    %263 = vector.extract_strided_slice %260 {offsets = [0, 64], sizes = [2, 32], strides = [1, 1]} : vector<2x128xf32> to vector<2x32xf32>
    %264 = vector.extract_strided_slice %259 {offsets = [0, 96], sizes = [2, 32], strides = [1, 1]} : vector<2x128xf32> to vector<2x32xf32>
    %265 = arith.mulf %262, %220 : vector<2x32xf32>
    %266 = arith.mulf %261, %263 : vector<2x32xf32>
    %267 = arith.addf %265, %266 : vector<2x32xf32>
    %268 = math.tanh %267 : vector<2x32xf32>
    %269 = arith.mulf %264, %268 : vector<2x32xf32>
    %270 = tpu.concatenate %269, %241 in 1 : vector<2x32xf32>, vector<2x32xf32> -> vector<2x64xf32>
    %cst_55 = arith.constant dense<0.000000e+00> : vector<2x128xf32>
    %271 = tpu.matmul %270, %1, %cst_55 {dimension_numbers = #tpu.dot_dimension_numbers<[1], [0], [0], [1], [0, 0, 1, 1], [], []>} : vector<2x64xf32>, vector<64x128xf32>, vector<2x128xf32> -> vector<2x128xf32>
    %272 = vector.broadcast %2 : vector<1x128xf32> to vector<2x128xf32>
    %273 = arith.addf %271, %272 : vector<2x128xf32>
    %274 = arith.negf %273 : vector<2x128xf32>
    %275 = math.exp %274 : vector<2x128xf32>
    %cst_56 = arith.constant 1.000000e+00 : f32
    %276 = vector.broadcast %cst_56 : f32 to vector<2x128xf32>
    %277 = arith.addf %276, %275 : vector<2x128xf32>
    %278 = arith.divf %276, %277 : vector<2x128xf32>
    %279 = math.tanh %273 : vector<2x128xf32>
    %280 = vector.extract_strided_slice %278 {offsets = [0, 0], sizes = [2, 32], strides = [1, 1]} : vector<2x128xf32> to vector<2x32xf32>
    %281 = vector.extract_strided_slice %278 {offsets = [0, 32], sizes = [2, 32], strides = [1, 1]} : vector<2x128xf32> to vector<2x32xf32>
    %282 = vector.extract_strided_slice %279 {offsets = [0, 64], sizes = [2, 32], strides = [1, 1]} : vector<2x128xf32> to vector<2x32xf32>
    %283 = vector.extract_strided_slice %278 {offsets = [0, 96], sizes = [2, 32], strides = [1, 1]} : vector<2x128xf32> to vector<2x32xf32>
    %284 = arith.mulf %281, %239 : vector<2x32xf32>
    %285 = arith.mulf %280, %282 : vector<2x32xf32>
    %286 = arith.addf %284, %285 : vector<2x32xf32>
    %287 = math.tanh %286 : vector<2x32xf32>
    %288 = arith.mulf %283, %287 : vector<2x32xf32>
    %cst_57 = arith.constant dense<0.000000e+00> : vector<2x32xf32>
    %289 = tpu.matmul %288, %3, %cst_57 {dimension_numbers = #tpu.dot_dimension_numbers<[1], [0], [0], [1], [0, 0, 1, 1], [], []>} : vector<2x32xf32>, vector<32x32xf32>, vector<2x32xf32> -> vector<2x32xf32>
    %290 = vector.broadcast %4 : vector<1x32xf32> to vector<2x32xf32>
    %291 = arith.addf %289, %290 : vector<2x32xf32>
    %292 = math.tanh %291 : vector<2x32xf32>
    %293 = vector.broadcast %5 : vector<1x32xf32> to vector<2x32xf32>
    %294 = arith.mulf %292, %293 : vector<2x32xf32>
    %cst_58 = arith.constant dense<0.000000e+00> : vector<2xf32>
    %295 = vector.multi_reduction <add>, %294, %cst_58 [1] : vector<2x32xf32> to vector<2xf32>
    %296 = vector.shape_cast %295 : vector<2xf32> to vector<2x1xf32>
    %297 = vector.broadcast %6 : vector<1x1xf32> to vector<2x1xf32>
    %298 = arith.addf %296, %297 : vector<2x1xf32>
    %299 = vector.extract_strided_slice %12 {offsets = [12, 0], sizes = [2, 128], strides = [1, 1]} : vector<16x128xf32> to vector<2x128xf32>
    %cst_59 = arith.constant dense<0.000000e+00> : vector<2x128xf32>
    %300 = tpu.matmul %269, %0, %cst_59 {dimension_numbers = #tpu.dot_dimension_numbers<[1], [0], [0], [1], [0, 0, 1, 1], [], []>} : vector<2x32xf32>, vector<32x128xf32>, vector<2x128xf32> -> vector<2x128xf32>
    %301 = arith.addf %299, %300 : vector<2x128xf32>
    %302 = arith.negf %301 : vector<2x128xf32>
    %303 = math.exp %302 : vector<2x128xf32>
    %cst_60 = arith.constant 1.000000e+00 : f32
    %304 = vector.broadcast %cst_60 : f32 to vector<2x128xf32>
    %305 = arith.addf %304, %303 : vector<2x128xf32>
    %306 = arith.divf %304, %305 : vector<2x128xf32>
    %307 = math.tanh %301 : vector<2x128xf32>
    %308 = vector.extract_strided_slice %306 {offsets = [0, 0], sizes = [2, 32], strides = [1, 1]} : vector<2x128xf32> to vector<2x32xf32>
    %309 = vector.extract_strided_slice %306 {offsets = [0, 32], sizes = [2, 32], strides = [1, 1]} : vector<2x128xf32> to vector<2x32xf32>
    %310 = vector.extract_strided_slice %307 {offsets = [0, 64], sizes = [2, 32], strides = [1, 1]} : vector<2x128xf32> to vector<2x32xf32>
    %311 = vector.extract_strided_slice %306 {offsets = [0, 96], sizes = [2, 32], strides = [1, 1]} : vector<2x128xf32> to vector<2x32xf32>
    %312 = arith.mulf %309, %267 : vector<2x32xf32>
    %313 = arith.mulf %308, %310 : vector<2x32xf32>
    %314 = arith.addf %312, %313 : vector<2x32xf32>
    %315 = math.tanh %314 : vector<2x32xf32>
    %316 = arith.mulf %311, %315 : vector<2x32xf32>
    %317 = tpu.concatenate %316, %288 in 1 : vector<2x32xf32>, vector<2x32xf32> -> vector<2x64xf32>
    %cst_61 = arith.constant dense<0.000000e+00> : vector<2x128xf32>
    %318 = tpu.matmul %317, %1, %cst_61 {dimension_numbers = #tpu.dot_dimension_numbers<[1], [0], [0], [1], [0, 0, 1, 1], [], []>} : vector<2x64xf32>, vector<64x128xf32>, vector<2x128xf32> -> vector<2x128xf32>
    %319 = vector.broadcast %2 : vector<1x128xf32> to vector<2x128xf32>
    %320 = arith.addf %318, %319 : vector<2x128xf32>
    %321 = arith.negf %320 : vector<2x128xf32>
    %322 = math.exp %321 : vector<2x128xf32>
    %cst_62 = arith.constant 1.000000e+00 : f32
    %323 = vector.broadcast %cst_62 : f32 to vector<2x128xf32>
    %324 = arith.addf %323, %322 : vector<2x128xf32>
    %325 = arith.divf %323, %324 : vector<2x128xf32>
    %326 = math.tanh %320 : vector<2x128xf32>
    %327 = vector.extract_strided_slice %325 {offsets = [0, 0], sizes = [2, 32], strides = [1, 1]} : vector<2x128xf32> to vector<2x32xf32>
    %328 = vector.extract_strided_slice %325 {offsets = [0, 32], sizes = [2, 32], strides = [1, 1]} : vector<2x128xf32> to vector<2x32xf32>
    %329 = vector.extract_strided_slice %326 {offsets = [0, 64], sizes = [2, 32], strides = [1, 1]} : vector<2x128xf32> to vector<2x32xf32>
    %330 = vector.extract_strided_slice %325 {offsets = [0, 96], sizes = [2, 32], strides = [1, 1]} : vector<2x128xf32> to vector<2x32xf32>
    %331 = arith.mulf %328, %286 : vector<2x32xf32>
    %332 = arith.mulf %327, %329 : vector<2x32xf32>
    %333 = arith.addf %331, %332 : vector<2x32xf32>
    %334 = math.tanh %333 : vector<2x32xf32>
    %335 = arith.mulf %330, %334 : vector<2x32xf32>
    %cst_63 = arith.constant dense<0.000000e+00> : vector<2x32xf32>
    %336 = tpu.matmul %335, %3, %cst_63 {dimension_numbers = #tpu.dot_dimension_numbers<[1], [0], [0], [1], [0, 0, 1, 1], [], []>} : vector<2x32xf32>, vector<32x32xf32>, vector<2x32xf32> -> vector<2x32xf32>
    %337 = vector.broadcast %4 : vector<1x32xf32> to vector<2x32xf32>
    %338 = arith.addf %336, %337 : vector<2x32xf32>
    %339 = math.tanh %338 : vector<2x32xf32>
    %340 = vector.broadcast %5 : vector<1x32xf32> to vector<2x32xf32>
    %341 = arith.mulf %339, %340 : vector<2x32xf32>
    %cst_64 = arith.constant dense<0.000000e+00> : vector<2xf32>
    %342 = vector.multi_reduction <add>, %341, %cst_64 [1] : vector<2x32xf32> to vector<2xf32>
    %343 = vector.shape_cast %342 : vector<2xf32> to vector<2x1xf32>
    %344 = vector.broadcast %6 : vector<1x1xf32> to vector<2x1xf32>
    %345 = arith.addf %343, %344 : vector<2x1xf32>
    %346 = vector.extract_strided_slice %12 {offsets = [14, 0], sizes = [2, 128], strides = [1, 1]} : vector<16x128xf32> to vector<2x128xf32>
    %cst_65 = arith.constant dense<0.000000e+00> : vector<2x128xf32>
    %347 = tpu.matmul %316, %0, %cst_65 {dimension_numbers = #tpu.dot_dimension_numbers<[1], [0], [0], [1], [0, 0, 1, 1], [], []>} : vector<2x32xf32>, vector<32x128xf32>, vector<2x128xf32> -> vector<2x128xf32>
    %348 = arith.addf %346, %347 : vector<2x128xf32>
    %349 = arith.negf %348 : vector<2x128xf32>
    %350 = math.exp %349 : vector<2x128xf32>
    %cst_66 = arith.constant 1.000000e+00 : f32
    %351 = vector.broadcast %cst_66 : f32 to vector<2x128xf32>
    %352 = arith.addf %351, %350 : vector<2x128xf32>
    %353 = arith.divf %351, %352 : vector<2x128xf32>
    %354 = math.tanh %348 : vector<2x128xf32>
    %355 = vector.extract_strided_slice %353 {offsets = [0, 0], sizes = [2, 32], strides = [1, 1]} : vector<2x128xf32> to vector<2x32xf32>
    %356 = vector.extract_strided_slice %353 {offsets = [0, 32], sizes = [2, 32], strides = [1, 1]} : vector<2x128xf32> to vector<2x32xf32>
    %357 = vector.extract_strided_slice %354 {offsets = [0, 64], sizes = [2, 32], strides = [1, 1]} : vector<2x128xf32> to vector<2x32xf32>
    %358 = vector.extract_strided_slice %353 {offsets = [0, 96], sizes = [2, 32], strides = [1, 1]} : vector<2x128xf32> to vector<2x32xf32>
    %359 = arith.mulf %356, %314 : vector<2x32xf32>
    %360 = arith.mulf %355, %357 : vector<2x32xf32>
    %361 = arith.addf %359, %360 : vector<2x32xf32>
    %362 = math.tanh %361 : vector<2x32xf32>
    %363 = arith.mulf %358, %362 : vector<2x32xf32>
    %364 = tpu.concatenate %363, %335 in 1 : vector<2x32xf32>, vector<2x32xf32> -> vector<2x64xf32>
    %cst_67 = arith.constant dense<0.000000e+00> : vector<2x128xf32>
    %365 = tpu.matmul %364, %1, %cst_67 {dimension_numbers = #tpu.dot_dimension_numbers<[1], [0], [0], [1], [0, 0, 1, 1], [], []>} : vector<2x64xf32>, vector<64x128xf32>, vector<2x128xf32> -> vector<2x128xf32>
    %366 = vector.broadcast %2 : vector<1x128xf32> to vector<2x128xf32>
    %367 = arith.addf %365, %366 : vector<2x128xf32>
    %368 = arith.negf %367 : vector<2x128xf32>
    %369 = math.exp %368 : vector<2x128xf32>
    %cst_68 = arith.constant 1.000000e+00 : f32
    %370 = vector.broadcast %cst_68 : f32 to vector<2x128xf32>
    %371 = arith.addf %370, %369 : vector<2x128xf32>
    %372 = arith.divf %370, %371 : vector<2x128xf32>
    %373 = math.tanh %367 : vector<2x128xf32>
    %374 = vector.extract_strided_slice %372 {offsets = [0, 0], sizes = [2, 32], strides = [1, 1]} : vector<2x128xf32> to vector<2x32xf32>
    %375 = vector.extract_strided_slice %372 {offsets = [0, 32], sizes = [2, 32], strides = [1, 1]} : vector<2x128xf32> to vector<2x32xf32>
    %376 = vector.extract_strided_slice %373 {offsets = [0, 64], sizes = [2, 32], strides = [1, 1]} : vector<2x128xf32> to vector<2x32xf32>
    %377 = vector.extract_strided_slice %372 {offsets = [0, 96], sizes = [2, 32], strides = [1, 1]} : vector<2x128xf32> to vector<2x32xf32>
    %378 = arith.mulf %375, %333 : vector<2x32xf32>
    %379 = arith.mulf %374, %376 : vector<2x32xf32>
    %380 = arith.addf %378, %379 : vector<2x32xf32>
    %381 = math.tanh %380 : vector<2x32xf32>
    %382 = arith.mulf %377, %381 : vector<2x32xf32>
    %cst_69 = arith.constant dense<0.000000e+00> : vector<2x32xf32>
    %383 = tpu.matmul %382, %3, %cst_69 {dimension_numbers = #tpu.dot_dimension_numbers<[1], [0], [0], [1], [0, 0, 1, 1], [], []>} : vector<2x32xf32>, vector<32x32xf32>, vector<2x32xf32> -> vector<2x32xf32>
    %384 = vector.broadcast %4 : vector<1x32xf32> to vector<2x32xf32>
    %385 = arith.addf %383, %384 : vector<2x32xf32>
    %386 = math.tanh %385 : vector<2x32xf32>
    %387 = vector.broadcast %5 : vector<1x32xf32> to vector<2x32xf32>
    %388 = arith.mulf %386, %387 : vector<2x32xf32>
    %cst_70 = arith.constant dense<0.000000e+00> : vector<2xf32>
    %389 = vector.multi_reduction <add>, %388, %cst_70 [1] : vector<2x32xf32> to vector<2xf32>
    %390 = vector.shape_cast %389 : vector<2xf32> to vector<2x1xf32>
    %391 = vector.broadcast %6 : vector<1x1xf32> to vector<2x1xf32>
    %392 = arith.addf %390, %391 : vector<2x1xf32>
    %393 = arith.maximumf %63, %110 : vector<2x1xf32>
    %394 = arith.maximumf %393, %157 : vector<2x1xf32>
    %395 = arith.maximumf %394, %204 : vector<2x1xf32>
    %396 = arith.maximumf %395, %251 : vector<2x1xf32>
    %397 = arith.maximumf %396, %298 : vector<2x1xf32>
    %398 = arith.maximumf %397, %345 : vector<2x1xf32>
    %399 = arith.maximumf %398, %392 : vector<2x1xf32>
    %400 = arith.subf %63, %399 : vector<2x1xf32>
    %401 = math.exp %400 : vector<2x1xf32>
    %402 = arith.subf %110, %399 : vector<2x1xf32>
    %403 = math.exp %402 : vector<2x1xf32>
    %404 = arith.subf %157, %399 : vector<2x1xf32>
    %405 = math.exp %404 : vector<2x1xf32>
    %406 = arith.subf %204, %399 : vector<2x1xf32>
    %407 = math.exp %406 : vector<2x1xf32>
    %408 = arith.subf %251, %399 : vector<2x1xf32>
    %409 = math.exp %408 : vector<2x1xf32>
    %410 = arith.subf %298, %399 : vector<2x1xf32>
    %411 = math.exp %410 : vector<2x1xf32>
    %412 = arith.subf %345, %399 : vector<2x1xf32>
    %413 = math.exp %412 : vector<2x1xf32>
    %414 = arith.subf %392, %399 : vector<2x1xf32>
    %415 = math.exp %414 : vector<2x1xf32>
    %416 = arith.addf %401, %403 : vector<2x1xf32>
    %417 = arith.addf %416, %405 : vector<2x1xf32>
    %418 = arith.addf %417, %407 : vector<2x1xf32>
    %419 = arith.addf %418, %409 : vector<2x1xf32>
    %420 = arith.addf %419, %411 : vector<2x1xf32>
    %421 = arith.addf %420, %413 : vector<2x1xf32>
    %422 = arith.addf %421, %415 : vector<2x1xf32>
    %423 = tpu.reciprocal %422 : vector<2x1xf32> -> vector<2x1xf32>
    %424 = arith.mulf %401, %423 : vector<2x1xf32>
    %425 = vector.broadcast %424 : vector<2x1xf32> to vector<2x32xf32>
    %426 = arith.mulf %425, %53 : vector<2x32xf32>
    %427 = arith.mulf %403, %423 : vector<2x1xf32>
    %428 = vector.broadcast %427 : vector<2x1xf32> to vector<2x32xf32>
    %429 = arith.mulf %428, %100 : vector<2x32xf32>
    %430 = arith.addf %426, %429 : vector<2x32xf32>
    %431 = arith.mulf %405, %423 : vector<2x1xf32>
    %432 = vector.broadcast %431 : vector<2x1xf32> to vector<2x32xf32>
    %433 = arith.mulf %432, %147 : vector<2x32xf32>
    %434 = arith.addf %430, %433 : vector<2x32xf32>
    %435 = arith.mulf %407, %423 : vector<2x1xf32>
    %436 = vector.broadcast %435 : vector<2x1xf32> to vector<2x32xf32>
    %437 = arith.mulf %436, %194 : vector<2x32xf32>
    %438 = arith.addf %434, %437 : vector<2x32xf32>
    %439 = arith.mulf %409, %423 : vector<2x1xf32>
    %440 = vector.broadcast %439 : vector<2x1xf32> to vector<2x32xf32>
    %441 = arith.mulf %440, %241 : vector<2x32xf32>
    %442 = arith.addf %438, %441 : vector<2x32xf32>
    %443 = arith.mulf %411, %423 : vector<2x1xf32>
    %444 = vector.broadcast %443 : vector<2x1xf32> to vector<2x32xf32>
    %445 = arith.mulf %444, %288 : vector<2x32xf32>
    %446 = arith.addf %442, %445 : vector<2x32xf32>
    %447 = arith.mulf %413, %423 : vector<2x1xf32>
    %448 = vector.broadcast %447 : vector<2x1xf32> to vector<2x32xf32>
    %449 = arith.mulf %448, %335 : vector<2x32xf32>
    %450 = arith.addf %446, %449 : vector<2x32xf32>
    %451 = arith.mulf %415, %423 : vector<2x1xf32>
    %452 = vector.broadcast %451 : vector<2x1xf32> to vector<2x32xf32>
    %453 = arith.mulf %452, %382 : vector<2x32xf32>
    %454 = arith.addf %450, %453 : vector<2x32xf32>
    %c0_71 = arith.constant 0 : index
    %c0_72 = arith.constant 0 : index
    %455 = vector.load %arg10[%c0_71, %c0_72] : memref<32x128xf32, #tpu.memory_space<vmem>>, vector<32x128xf32>
    %cst_73 = arith.constant dense<0.000000e+00> : vector<2x128xf32>
    %456 = tpu.matmul %454, %455, %cst_73 {dimension_numbers = #tpu.dot_dimension_numbers<[1], [0], [0], [1], [0, 0, 1, 1], [], []>} : vector<2x32xf32>, vector<32x128xf32>, vector<2x128xf32> -> vector<2x128xf32>
    %c0_74 = arith.constant 0 : index
    %c0_75 = arith.constant 0 : index
    %457 = vector.load %arg11[%c0_74, %c0_75] : memref<1x128xf32, #tpu.memory_space<vmem>>, vector<1x128xf32>
    %458 = vector.broadcast %457 : vector<1x128xf32> to vector<2x128xf32>
    %459 = arith.addf %456, %458 : vector<2x128xf32>
    %cst_76 = arith.constant 0.000000e+00 : f32
    %460 = vector.broadcast %cst_76 : f32 to vector<2x128xf32>
    %461 = arith.maximumf %459, %460 : vector<2x128xf32>
    %c0_77 = arith.constant 0 : index
    %c0_78 = arith.constant 0 : index
    %462 = vector.load %arg12[%c0_77, %c0_78] : memref<128x4xf32, #tpu.memory_space<vmem>>, vector<128x4xf32>
    %cst_79 = arith.constant dense<0.000000e+00> : vector<2x4xf32>
    %463 = tpu.matmul %461, %462, %cst_79 {dimension_numbers = #tpu.dot_dimension_numbers<[1], [0], [0], [1], [0, 0, 1, 1], [], []>} : vector<2x128xf32>, vector<128x4xf32>, vector<2x4xf32> -> vector<2x4xf32>
    %c0_80 = arith.constant 0 : index
    %c0_81 = arith.constant 0 : index
    %464 = vector.load %arg13[%c0_80, %c0_81] : memref<1x4xf32, #tpu.memory_space<vmem>>, vector<1x4xf32>
    %465 = vector.broadcast %464 : vector<1x4xf32> to vector<2x4xf32>
    %466 = arith.addf %463, %465 : vector<2x4xf32>
    %c0_82 = arith.constant 0 : index
    %c0_83 = arith.constant 0 : index
    %467 = vector.load %arg14[%c0_82, %c0_83] : memref<2x4xf32, #tpu.memory_space<vmem>>, vector<2x4xf32>
    tpu.vector_store %arg14[%c0_82, %c0_83], %466 {strides = array<i32>} : memref<2x4xf32, #tpu.memory_space<vmem>>, vector<2x4xf32>,
    return
  }
}

</mosaic_0001>

<bundles_post_ra>
// kernel: lstm_model_forward.1
= control target key start
LH: loop header
LB: loop body
LE: loop exit
PB: predicated region body
PF: predicated region fallthrough
CT: control target
= control target key end

     0   :  { %s4643_s0 = inlined_call_operand.vmem [shape: f32[16,16], index: 0, kind: input, shape index: {}]   ;;  %s4644_s1 = inlined_call_operand.vmem [shape: f32[16,128], index: 1, kind: input, shape index: {}]   ;;  %s4645_s2 = inlined_call_operand.vmem [shape: f32[32,128], index: 2, kind: input, shape index: {}]   ;;  %s4646_s3 = inlined_call_operand.vmem [shape: f32[1,128], index: 3, kind: input, shape index: {}]   ;;  %s4647_s4 = inlined_call_operand.vmem [shape: f32[64,128], index: 4, kind: input, shape index: {}]   ;;  %s4648_s5 = inlined_call_operand.vmem [shape: f32[1,128], index: 5, kind: input, shape index: {}]   ;;  %s4649_s6 = inlined_call_operand.vmem [shape: f32[32,32], index: 6, kind: input, shape index: {}]   ;;  %s4650_s7 = inlined_call_operand.hbm [shape: f32[1,32], index: 7, kind: input, shape index: {}]   ;;  %s4651_s8 = inlined_call_operand.vmem [shape: f32[1,32], index: 8, kind: input, shape index: {}]   ;;  %s4652_s9 = inlined_call_operand.<no memory space> [shape: f32[1,1], index: 9, kind: input, shape index: {}]   ;;  %s4653_s10 = inlined_call_operand.vmem [shape: f32[32,128], index: 10, kind: input, shape index: {}]   ;;  %s4654_s11 = inlined_call_operand.hbm [shape: f32[1,128], index: 11, kind: input, shape index: {}]   ;;  %s4655_s12 = inlined_call_operand.vmem [shape: f32[128,4], index: 12, kind: input, shape index: {}]   ;;  %s4656_s13 = inlined_call_operand.vmem [shape: f32[1,4], index: 13, kind: input, shape index: {}]   ;;  %s4657_s14 = inlined_call_operand.hbm [shape: f32[2,4], index: 14, kind: output, shape index: {}]  }
   0x1   :  { %v19_v0 = vstv %s4652_s9 }
   0x2   :  { %20 = vst [vmem:[#allocation2] sm:$0x1] %v19_v0 }
   0x3   :  { %21 = vsyncpa [#allocation4], 0 }
   0x4   :  { %22 = vsyncpa [#allocation7], 0 }
   0x5   :  { %23 = vsyncpa [#allocation5], 0  ;;  %s3922_s15 = smov [#allocation3]   ;;  %s3923_s17 = smov [#allocation6]  }
   0x6   :  { %s44_s16 = sshll.u32 %s3922_s15, 4  ;;  %s60_s18 = sshll.u32 %s3923_s17, 4  ;;  %s45_s16 = int_to_ptr.vmem [resolvable:$true] %s44_s16  ;;  %s61_s18 = int_to_ptr.vmem [resolvable:$true] %s60_s18 }
   0x7   :  { %s3850_s21 = scalar_lea.hbm %s4650_s7, 16 }
   0x8   :  { %p3851_p0 = scmp.ne.s32.totalorder %s4650_s7, %s3850_s21  ;;  %p3854_p1 = scmp.lt.u32.totalorder %s3850_s21, %s4650_s7 }
   0xa   :  { %p3856_p2 = pnand %p3854_p1, %p3851_p0 }
   0xc   :  { %3859 = shalt.err (!%p3856_p2)
}
   0xd   :  { %s3860_s25 = scalar_lea.vmem %s45_s16, 16  ;;  %s3864_s26 = scalar_lea.vmem %s45_s16, 32 }
   0xe   :  { %p3861_p3 = scmp.ne.s32.totalorder %s45_s16, %s3860_s25  ;;  %p3865_p4 = scmp.lt.s32.totalorder %s45_s16, %s45_s16 }
   0xf   :  { %p3866_p5 = scmp.lt.s32.totalorder %s3864_s26, %s3860_s25 }
  0x11   :  { %p3867_p6 = por %p3866_p5, %p3865_p4 }
  0x13   :  { %p3868_p7 = pnand %p3867_p6, %p3861_p3 }
  0x15   :  { %3871 = shalt.err (!%p3868_p7)
}
  0x16   :  { %47 = dma.hbm_to_vmem [thread:$0]  %s4650_s7, 16, %s45_s16, [#allocation4]  }
  0x17   :  { %s3872_s15 = scalar_lea.hbm %s4654_s11, 16 }
  0x18   :  { %p3873_p8 = scmp.ne.s32.totalorder %s4654_s11, %s3872_s15  ;;  %p3876_p9 = scmp.lt.u32.totalorder %s3872_s15, %s4654_s11 }
  0x1a   :  { %p3878_p10 = pnand %p3876_p9, %p3873_p8 }
  0x1c   :  { %3881 = shalt.err (!%p3878_p10)
}
  0x1d   :  { %s3882_s22 = scalar_lea.vmem %s61_s18, 16  ;;  %s3886_s23 = scalar_lea.vmem %s61_s18, 32 }
  0x1e   :  { %p3883_p11 = scmp.ne.s32.totalorder %s61_s18, %s3882_s22  ;;  %p3887_p12 = scmp.lt.s32.totalorder %s61_s18, %s61_s18 }
  0x1f   :  { %p3888_p13 = scmp.lt.s32.totalorder %s3886_s23, %s3882_s22 }
  0x21   :  { %p3889_p0 = por %p3888_p13, %p3887_p12 }
  0x23   :  { %p3890_p1 = pnand %p3889_p0, %p3883_p11 }
  0x25   :  { %3893 = shalt.err (!%p3890_p1)
}
  0x26   :  { %63 = dma.hbm_to_vmem [thread:$0]  %s4654_s11, 16, %s61_s18, [#allocation7]  }
  0x27   :  { %3916 = dma.done.wait [#allocation4], 16  }
  0x28   :  { %3917 = vsyncadd [#allocation4], 4294967280 }
  0x29   :  { %3918 = dma.done.wait [#allocation7], 16  }
  0x2a   :  { %3919 = vsyncadd [#allocation7], 4294967280  ;;  %v3924_v1 = vmov 0.0|0.0   ;;  %vm3925_vm0 = vmmov 0   ;;  %v3926_v2 = vmov 0.0   ;;  %vm105_vm1 = vcmask 130048  }
  0x2b   :  { %3454 = vmatprep.subr.bf16.mxu1 %v3924_v1  ;;  %3084 = vmatprep.mubr.msk.f32.mxu1 %vm3925_vm0, %v3926_v2  ;;  %v96_v3 = vld [vmem:[%s4644_s1] sm:$0xff]  ;;  %v97_v4 = vld [vmem:[%s4644_s1 + $0x8] sm:$0xff]  ;;  %v76_v10 = vld [vmem:[%s4645_s2 + $0x10] sm:$0xff]  ;;  %s3927_s22 = smov 64   ;;  %vm187_vm2 = vcmask 261120   ;;  %vm297_vm3 = vcmask 523264  }
  0x2c   :  { %v74_v5 = vld [vmem:[%s4645_s2] sm:$0xff]  ;;  %v3450_v6 = vpack.c.bf16 %v97_v4, %v96_v3  ;;  %v75_v7 = vld [vmem:[%s4645_s2 + $0x8] sm:$0xff]  ;;  %v77_v11 = vld [vmem:[%s4645_s2 + $0x18] sm:$0xff]  ;;  %vm484_vm4 = vcmask 254976   ;;  %s3930_s19 = smov [#allocation8]   ;;  %vm2824_vm5 = vcmask 25600  }
  0x2d   :  { %v94_v8 = vld [vmem:[%s4643_s0] sm:$0xff]  ;;  %v4051_v9 = vpack.c.bf16 %v75_v7, %v74_v5  ;;  %v95_v12 = vld [vmem:[%s4643_s0 + $0x8] sm:$0xff]  ;;  %v4064_v13 = vpack.c.bf16 %v77_v11, %v76_v10  ;;  %v80_v34 = vld [vmem:[%s4647_s4 + $0x10] sm:$0xff]  ;;  %s2832_s20 = sshll.u32 %s3930_s19, 4  ;;  %s2833_s20 = int_to_ptr.vmem [resolvable:$true] %s2832_s20 }
  0x2e   :  { %3073 = vmatprep.mubr.msk.f32.mxu0 %vm105_vm1, %v94_v8  ;;  %3451 = vmatprep.subr.bf16.mxu0 %v3450_v6  ;;  %v2842_v14 = vld [vmem:[%s4646_s3] ss:$0 sm:$0xff]  ;;  %s3928_s3 = smov 32   ;;  %v79_v33 = vld [vmem:[%s4647_s4 + $0x8] sm:$0xff]  ;;  %v81_v36 = vld [vmem:[%s4647_s4 + $0x18] sm:$0xff]  ;;  %p3899_p3 = scmp.lt.s32.totalorder %s2833_s20, %s2833_s20 }
  0x2f   :  { %3456 = vmatpush3.bf16.msra.mxu1 %v4051_v9  ;;  %3453 = vmatpush3.bf16.msra.mxu0 %v3450_v6  ;;  %v78_v32 = vld [vmem:[%s4647_s4] sm:$0xff]  ;;  %v4104_v37 = vpack.c.bf16 %v81_v36, %v80_v34  ;;  %v83_v39 = vld [vmem:[%s4647_s4 + $0x28] sm:$0xff]  ;;  %v84_v41 = vld [vmem:[%s4647_s4 + $0x30] sm:$0xff] }
  0x30   :  { %3457 = vmatprep.subr.bf16.mxu1 %v3924_v1  ;;  %3484 = vmatprep.subr.bf16.mxu0 %v3924_v1  ;;  %v4098_v35 = vpack.c.bf16 %v79_v33, %v78_v32  ;;  %v82_v38 = vld [vmem:[%s4647_s4 + $0x20] sm:$0xff]  ;;  %v85_v42 = vld [vmem:[%s4647_s4 + $0x38] sm:$0xff]  ;;  %v88_v0 = vld [vmem:[%s4649_s6 + $0x8] sm:$0xff] }
  0x31   :  { %v4116_v40 = vpack.c.bf16 %v83_v39, %v82_v38  ;;  %v4129_v44 = vpack.c.bf16 %v85_v42, %v84_v41  ;;  %v4146_v49 = vld [vmem:[%s4648_s5] ss:$0 sm:$0xff]  ;;  %v89_v3 = vld [vmem:[%s4649_s6 + $0x10] sm:$0xff]  ;;  %v90_v5 = vld [vmem:[%s4649_s6 + $0x18] sm:$0xff] }
  0x32   :  { %3074 = vmatmul.mubr.msk.f32.vlgmr.msra.gmra.mrb[0].mxu0 %vm105_vm1, %v95_v12  ;;  %v87_v63 = vld [vmem:[%s4649_s6] sm:$0xff]  ;;  %v4169_v6 = vpack.c.bf16 %v90_v5, %v89_v3 }
  0x33   :  { %3459 = vmatpush3.bf16.msra.mxu1 %v4064_v13  ;;  %3144 = vmatprep.mubr.msk.f32.mxu0 %vm3925_vm0, %v3926_v2  ;;  %v4163_v4 = vpack.c.bf16 %v88_v0, %v87_v63 }
  0x34   :  { %3460 = vmatprep.subr.bf16.mxu1 %v3924_v1  ;;  %3486 = vmatpush3.bf16.msra.mxu0 %v4098_v35 }
  0x35   :  { %3487 = vmatprep.subr.bf16.mxu0 %v3924_v1 }
  0x36   :  { %3085 = vmatmul.mubr.f32.vlgmr.msra.gmra.mrb[0].mxu1 %v3926_v2 }
  0x37   :  { %3103 = vmatprep.mubr.msk.f32.mxu1 %vm3925_vm0, %v3926_v2  ;;  %3462 = vmatpush3.bf16.msra.mxu1 %v4098_v35 }
  0x38   :  { %3463 = vmatprep.subr.bf16.mxu1 %v3924_v1  ;;  %3489 = vmatpush3.bf16.msra.mxu0 %v4104_v37 }
  0x39   :  { %3490 = vmatprep.subr.bf16.mxu0 %v3924_v1 }
  0x3b   :  { %3465 = vmatpush3.bf16.msra.mxu1 %v4104_v37 }
  0x3c   :  { %3466 = vmatprep.subr.bf16.mxu1 %v3924_v1  ;;  %3492 = vmatpush3.bf16.msra.mxu0 %v4116_v40 }
  0x3d   :  { %3493 = vmatprep.subr.bf16.mxu0 %v3924_v1 }
  0x3f   :  { %3468 = vmatpush3.bf16.msra.mxu1 %v4116_v40 }
  0x40   :  { %3469 = vmatprep.subr.bf16.mxu1 %v3924_v1  ;;  %3495 = vmatpush3.bf16.msra.mxu0 %v4129_v44 }
  0x41   :  { %3508 = vmatprep.subr.bf16.mxu0 %v3924_v1 }
  0x43   :  { %3471 = vmatpush3.bf16.msra.mxu1 %v4129_v44 }
  0x44   :  { %3472 = vmatprep.subr.bf16.mxu1 %v3924_v1 }
 0x105   :  { %v3075_v15 = vpop.f32.mrb[0].mxu0 }
 0x106   :  { %v4079_v16 = vadd.f32 %v3075_v15, %v2842_v14  ;;  %v178_v17 = vpop.f32.mrb[1].mxu0 }
 0x107   :  { %v4081_v18 = vadd.f32 %v2842_v14, %v178_v17 }
 0x109   :  { %v257_v19 = vpop.f32.mrb[0].mxu1 }
 0x10a   :  { %v261_v20 = vadd.f32 %v257_v19, %v4081_v18  ;;  %v3086_v21 = vpop.f32.mrb[1].mxu1 }
 0x10c   :  { %3687 = vtanh.f32 %v261_v20  ;;  %v2845_v23 = vmul.f32 -1.442695, %v261_v20 }
 0x10e   :  { %3689 = vpow2.f32 %v2845_v23 }
 0x116   :  { %v3688_v22 = vpop.eup %3687 }
 0x117   :  { %271 = vrot.lane.b32.xlu0 %v3688_v22, %s3927_s22 }
 0x118   :  { %v3690_v24 = vpop.eup %3689 }
 0x119   :  { %v265_v25 = vadd.f32 1.0, %v3690_v24 }
 0x11b   :  { %3691 = vrcp.f32 %v265_v25 }
 0x125   :  { %v3692_v26 = vpop.eup %3691 }
 0x126   :  { %v269_v29 = vmul.f32 0.0, %v3692_v26 }
 0x189   :  { %v272_v27 = vpop.permute.xlu0 %271 }
 0x18a   :  { %v274_v28 = vmul.f32 %v3692_v26, %v272_v27 }
 0x18c   :  { %276 = vrot.lane.b32.xlu0 %v274_v28, %s3928_s3 }
 0x1fe   :  { %v277_v30 = vpop.permute.xlu0 %276 }
 0x1ff   :  { %v4086_v31 = vadd.f32 %v277_v30, %v269_v29 }
 0x201   :  { %3693 = vtanh.f32 %v4086_v31  ;;  %v579_v28 = vrot.slane %v4086_v31, 6 }
 0x20b   :  { %v3694_v43 = vpop.eup %3693 }
 0x20c   :  { %282 = vrot.lane.b32.xlu1 %v3694_v43, %s3927_s22 }
 0x27e   :  { %v283_v45 = vpop.permute.xlu1 %282 }
 0x27f   :  { %v285_v46 = vmul.f32 %v3692_v26, %v283_v45 }
 0x281   :  { %287 = vrot.lane.b32.xlu1 %v285_v46, %s3928_s3 }
 0x2f3   :  { %v288_v47 = vpop.permute.xlu1 %287 }
 0x2f4   :  { %v290_v48 = vsel %vm187_vm2, %v288_v47, 0.0 }
 0x2f5   :  { %3104 = vmatmul.mubr.msk.f32.vlgmr.msra.gmra.mrb[2].mxu1 %vm297_vm3, %v290_v48 }
 0x2f6   :  { %3114 = vmatprep.mubr.msk.f32.mxu1 %vm3925_vm0, %v3926_v2  ;;  %3474 = vmatpush3.bf16.msra.mxu1 %v4163_v4 }
 0x2f7   :  { %3475 = vmatprep.subr.bf16.mxu1 %v3924_v1 }
 0x2fa   :  { %3477 = vmatpush3.bf16.msra.mxu1 %v4169_v6 }
 0x2fb   :  { %3478 = vmatprep.subr.bf16.mxu1 %v3924_v1 }
 0x3c8   :  { %v367_v50 = vpop.f32.mrb[2].mxu1 }
 0x3c9   :  { %v368_v51 = vadd.f32 %v4146_v49, %v367_v50  ;;  %v3105_v52 = vpop.f32.mrb[3].mxu1 }
 0x3cb   :  { %3695 = vtanh.f32 %v368_v51  ;;  %v2848_v54 = vmul.f32 -1.442695, %v368_v51 }
 0x3cd   :  { %3697 = vpow2.f32 %v2848_v54 }
 0x3d5   :  { %v3696_v53 = vpop.eup %3695 }
 0x3d6   :  { %380 = vrot.lane.b32.xlu0 %v3696_v53, %s3927_s22 }
 0x3d7   :  { %v3698_v55 = vpop.eup %3697 }
 0x3d8   :  { %v374_v56 = vadd.f32 1.0, %v3698_v55 }
 0x3da   :  { %3699 = vrcp.f32 %v374_v56 }
 0x3e4   :  { %v3700_v57 = vpop.eup %3699 }
 0x3e5   :  { %v378_v60 = vmul.f32 0.0, %v3700_v57 }
 0x448   :  { %v381_v58 = vpop.permute.xlu0 %380 }
 0x449   :  { %v383_v59 = vmul.f32 %v3700_v57, %v381_v58 }
 0x44b   :  { %385 = vrot.lane.b32.xlu1 %v383_v59, %s3928_s3 }
 0x4bd   :  { %v386_v61 = vpop.permute.xlu1 %385 }
 0x4be   :  { %v4151_v62 = vadd.f32 %v386_v61, %v378_v60 }
 0x4c0   :  { %3701 = vtanh.f32 %v4151_v62 }
 0x4ca   :  { %v3702_v7 = vpop.eup %3701 }
 0x4cb   :  { %391 = vrot.lane.b32.xlu0 %v3702_v7, %s3927_s22 }
 0x53d   :  { %v392_v8 = vpop.permute.xlu0 %391 }
 0x53e   :  { %v4175_v10 = vmul.f32 %v3700_v57, %v392_v8 }
 0x540   :  { %402 = vrot.lane.b32.xlu1 %v4175_v10, %s3928_s3  ;;  %v602_v34 = vrot.slane %v4175_v10, 6 }
 0x5b2   :  { %v403_v11 = vpop.permute.xlu1 %402 }
 0x5b3   :  { %3115 = vmatmul.mubr.msk.f32.vlgmr.msra.gmra.mrb[4].mxu1 %vm187_vm2, %v403_v11 }
 0x5b4   :  { %3480 = vmatpush3.bf16.msra.mxu1 %v4051_v9  ;;  %3125 = vmatprep.mubr.msk.f32.mxu1 %vm3925_vm0, %v3926_v2 }
 0x5b5   :  { %3481 = vmatprep.subr.bf16.mxu1 %v3924_v1 }
 0x5b8   :  { %3483 = vmatpush3.bf16.msra.mxu1 %v4064_v13 }
 0x5b9   :  { %3496 = vmatprep.subr.bf16.mxu1 %v3924_v1 }
 0x5bb   :  { %3126 = vmatmul.mubr.msk.f32.vlgmr.msra.gmra.mrb[6].mxu1 %vm187_vm2, %v288_v47 }
 0x5bc   :  { %3498 = vmatpush3.bf16.msra.mxu1 %v4163_v4  ;;  %3155 = vmatprep.mubr.msk.f32.mxu1 %vm3925_vm0, %v3926_v2 }
 0x5bd   :  { %3499 = vmatprep.subr.bf16.mxu1 %v3924_v1 }
 0x5c0   :  { %3501 = vmatpush3.bf16.msra.mxu1 %v4169_v6 }
 0x5c1   :  { %3502 = vmatprep.subr.bf16.mxu1 %v3924_v1 }
 0x686   :  { %v4193_v12 = vpop.f32.mrb[4].mxu1 }
 0x687   :  { %v3116_v14 = vpop.f32.mrb[5].mxu1 }
 0x68e   :  { %v563_v15 = vpop.f32.mrb[6].mxu1 }
 0x68f   :  { %v568_v17 = vrot.slane %v563_v15, 6  ;;  %v3127_v19 = vpop.f32.mrb[7].mxu1 }
 0x691   :  { %v570_v20 = vadd.f32 %v568_v17, %v4081_v18 }
 0x693   :  { %3703 = vtanh.f32 %v570_v20  ;;  %v2854_v22 = vmul.f32 -1.442695, %v570_v20 }
 0x695   :  { %3705 = vpow2.f32 %v2854_v22 }
 0x69d   :  { %v3704_v21 = vpop.eup %3703 }
 0x69e   :  { %583 = vrot.lane.b32.xlu0 %v3704_v21, %s3927_s22 }
 0x69f   :  { %v3706_v23 = vpop.eup %3705 }
 0x6a0   :  { %v574_v24 = vadd.f32 1.0, %v3706_v23 }
 0x6a2   :  { %3707 = vrcp.f32 %v574_v24 }
 0x6ac   :  { %v3708_v25 = vpop.eup %3707 }
 0x6ad   :  { %v581_v29 = vmul.f32 %v3708_v25, %v579_v28 }
 0x710   :  { %v584_v26 = vpop.permute.xlu0 %583 }
 0x711   :  { %v586_v27 = vmul.f32 %v3708_v25, %v584_v26 }
 0x713   :  { %588 = vrot.lane.b32.xlu1 %v586_v27, %s3928_s3 }
 0x785   :  { %v589_v30 = vpop.permute.xlu1 %588 }
 0x786   :  { %v4199_v32 = vadd.f32 %v589_v30, %v581_v29 }
 0x788   :  { %3709 = vtanh.f32 %v4199_v32  ;;  %v873_v23 = vrot.slane %v4199_v32, 6 }
 0x792   :  { %v3710_v33 = vpop.eup %3709 }
 0x793   :  { %594 = vrot.lane.b32.xlu0 %v3710_v33, %s3927_s22 }
 0x797   :  { %603 = vrot.lane.b32.xlu0 %v602_v34, %s3927_s22 }
 0x805   :  { %v595_v36 = vpop.permute.xlu0 %594 }
 0x806   :  { %v597_v38 = vmul.f32 %v3708_v25, %v595_v36 }
 0x808   :  { %599 = vrot.lane.b32.xlu1 %v597_v38, %s3928_s3  ;;  %v786_v59 = vrot.slane %v597_v38, 2 }
 0x809   :  { %v604_v39 = vpop.permute.xlu0 %603 }
 0x87a   :  { %v600_v41 = vpop.permute.xlu1 %599 }
 0x87b   :  { %v606_v31 = vsel %vm187_vm2, %v600_v41, %v604_v39 }
 0x87c   :  { %v608_v42 = vrot.slane %v606_v31, 2 }
 0x87e   :  { %3145 = vmatmul.mubr.msk.f32.vlgmr.msra.gmra.mrb[2].mxu0 %vm297_vm3, %v608_v42 }
 0x87f   :  { %3510 = vmatpush3.bf16.msra.mxu0 %v4098_v35  ;;  %3185 = vmatprep.mubr.msk.f32.mxu0 %vm3925_vm0, %v3926_v2 }
 0x880   :  { %3511 = vmatprep.subr.bf16.mxu0 %v3924_v1 }
 0x883   :  { %3513 = vmatpush3.bf16.msra.mxu0 %v4104_v37 }
 0x884   :  { %3514 = vmatprep.subr.bf16.mxu0 %v3924_v1 }
 0x887   :  { %3516 = vmatpush3.bf16.msra.mxu0 %v4116_v40 }
 0x888   :  { %3517 = vmatprep.subr.bf16.mxu0 %v3924_v1 }
 0x88b   :  { %3519 = vmatpush3.bf16.msra.mxu0 %v4129_v44 }
 0x88c   :  { %3532 = vmatprep.subr.bf16.mxu0 %v3924_v1 }
 0x951   :  { %v677_v43 = vpop.f32.mrb[2].mxu0 }
 0x952   :  { %v678_v45 = vadd.f32 %v4146_v49, %v677_v43  ;;  %v3146_v46 = vpop.f32.mrb[3].mxu0 }
 0x954   :  { %3711 = vtanh.f32 %v678_v45  ;;  %v2856_v48 = vmul.f32 -1.442695, %v678_v45 }
 0x956   :  { %3713 = vpow2.f32 %v2856_v48 }
 0x95e   :  { %v3712_v47 = vpop.eup %3711 }
 0x95f   :  { %690 = vrot.lane.b32.xlu1 %v3712_v47, %s3927_s22 }
 0x960   :  { %v3714_v50 = vpop.eup %3713 }
 0x961   :  { %v684_v51 = vadd.f32 1.0, %v3714_v50 }
 0x963   :  { %3715 = vrcp.f32 %v684_v51 }
 0x96d   :  { %v3716_v52 = vpop.eup %3715 }
 0x96e   :  { %v688_v55 = vmul.f32 %v3716_v52, %v4151_v62 }
 0x9d1   :  { %v691_v53 = vpop.permute.xlu1 %690 }
 0x9d2   :  { %v693_v54 = vmul.f32 %v3716_v52, %v691_v53 }
 0x9d4   :  { %695 = vrot.lane.b32.xlu0 %v693_v54, %s3928_s3 }
 0xa46   :  { %v696_v56 = vpop.permute.xlu0 %695 }
 0xa47   :  { %v4222_v57 = vadd.f32 %v696_v56, %v688_v55 }
 0xa49   :  { %3717 = vtanh.f32 %v4222_v57 }
 0xa53   :  { %v3718_v58 = vpop.eup %3717 }
 0xa54   :  { %701 = vrot.lane.b32.xlu1 %v3718_v58, %s3927_s22 }
 0xa58   :  { %787 = vrot.lane.b32.xlu1 %v786_v59, %s3928_s3 }
 0xac6   :  { %v702_v60 = vpop.permute.xlu1 %701 }
 0xac7   :  { %v4227_v61 = vmul.f32 %v3716_v52, %v702_v60 }
 0xac9   :  { %706 = vrot.lane.b32.xlu0 %v4227_v61, %s3928_s3  ;;  %v896_v28 = vrot.slane %v4227_v61, 4 }
 0xaca   :  { %v788_v62 = vpop.permute.xlu1 %787 }
 0xb3b   :  { %v707_v63 = vpop.permute.xlu0 %706 }
 0xb3c   :  { %3156 = vmatmul.mubr.msk.f32.vlgmr.msra.gmra.mrb[8].mxu1 %vm187_vm2, %v707_v63 }
 0xb3d   :  { %3504 = vmatpush3.bf16.msra.mxu1 %v4051_v9  ;;  %3166 = vmatprep.mubr.msk.f32.mxu1 %vm3925_vm0, %v3926_v2 }
 0xb3e   :  { %3505 = vmatprep.subr.bf16.mxu1 %v3924_v1 }
 0xb41   :  { %3507 = vmatpush3.bf16.msra.mxu1 %v4064_v13 }
 0xb42   :  { %3520 = vmatprep.subr.bf16.mxu1 %v3924_v1 }
 0xb44   :  { %3167 = vmatmul.mubr.msk.f32.vlgmr.msra.gmra.mrb[10].mxu1 %vm187_vm2, %v788_v62 }
 0xb45   :  { %3522 = vmatpush3.bf16.msra.mxu1 %v4163_v4  ;;  %3196 = vmatprep.mubr.msk.f32.mxu1 %vm3925_vm0, %v3926_v2 }
 0xb46   :  { %3523 = vmatprep.subr.bf16.mxu1 %v3924_v1 }
 0xb49   :  { %3525 = vmatpush3.bf16.msra.mxu1 %v4169_v6 }
 0xb4a   :  { %3526 = vmatprep.subr.bf16.mxu1 %v3924_v1 }
 0xc0f   :  { %v4245_v0 = vpop.f32.mrb[8].mxu1 }
 0xc10   :  { %v3157_v3 = vpop.f32.mrb[9].mxu1 }
 0xc17   :  { %v857_v5 = vpop.f32.mrb[10].mxu1 }
 0xc18   :  { %v862_v7 = vrot.slane %v857_v5, 4  ;;  %v3168_v8 = vpop.f32.mrb[11].mxu1 }
 0xc1a   :  { %v864_v11 = vadd.f32 %v862_v7, %v4081_v18 }
 0xc1c   :  { %3719 = vtanh.f32 %v864_v11  ;;  %v2859_v15 = vmul.f32 -1.442695, %v864_v11 }
 0xc1e   :  { %3721 = vpow2.f32 %v2859_v15 }
 0xc26   :  { %v3720_v14 = vpop.eup %3719 }
 0xc27   :  { %877 = vrot.lane.b32.xlu0 %v3720_v14, %s3927_s22 }
 0xc28   :  { %v3722_v17 = vpop.eup %3721 }
 0xc29   :  { %v868_v19 = vadd.f32 1.0, %v3722_v17 }
 0xc2b   :  { %3723 = vrcp.f32 %v868_v19 }
 0xc35   :  { %v3724_v20 = vpop.eup %3723 }
 0xc36   :  { %v875_v24 = vmul.f32 %v3724_v20, %v873_v23 }
 0xc99   :  { %v878_v21 = vpop.permute.xlu0 %877 }
 0xc9a   :  { %v880_v22 = vmul.f32 %v3724_v20, %v878_v21 }
 0xc9c   :  { %882 = vrot.lane.b32.xlu1 %v880_v22, %s3928_s3 }
 0xd0e   :  { %v883_v25 = vpop.permute.xlu1 %882 }
 0xd0f   :  { %v4251_v26 = vadd.f32 %v883_v25, %v875_v24 }
 0xd11   :  { %3725 = vtanh.f32 %v4251_v26 }
 0xd1b   :  { %v3726_v27 = vpop.eup %3725 }
 0xd1c   :  { %888 = vrot.lane.b32.xlu0 %v3726_v27, %s3927_s22 }
 0xd20   :  { %897 = vrot.lane.b32.xlu0 %v896_v28, %s3927_s22 }
 0xd8e   :  { %v889_v29 = vpop.permute.xlu0 %888 }
 0xd8f   :  { %v891_v30 = vmul.f32 %v3724_v20, %v889_v29  ;;  %v1167_v20 = vrot.slane %v4251_v26, 6 }
 0xd91   :  { %893 = vrot.lane.b32.xlu1 %v891_v30, %s3928_s3  ;;  %v1080_v54 = vrot.slane %v891_v30, 4 }
 0xd92   :  { %v898_v33 = vpop.permute.xlu0 %897 }
 0xe03   :  { %v894_v34 = vpop.permute.xlu1 %893 }
 0xe04   :  { %v900_v32 = vsel %vm187_vm2, %v894_v34, %v898_v33 }
 0xe05   :  { %v902_v36 = vrot.slane %v900_v32, 4 }
 0xe07   :  { %3186 = vmatmul.mubr.msk.f32.vlgmr.msra.gmra.mrb[4].mxu0 %vm297_vm3, %v902_v36 }
 0xe08   :  { %3534 = vmatpush3.bf16.msra.mxu0 %v4098_v35  ;;  %3226 = vmatprep.mubr.msk.f32.mxu0 %vm3925_vm0, %v3926_v2 }
 0xe09   :  { %3535 = vmatprep.subr.bf16.mxu0 %v3924_v1 }
 0xe0c   :  { %3537 = vmatpush3.bf16.msra.mxu0 %v4104_v37 }
 0xe0d   :  { %3538 = vmatprep.subr.bf16.mxu0 %v3924_v1 }
 0xe10   :  { %3540 = vmatpush3.bf16.msra.mxu0 %v4116_v40 }
 0xe11   :  { %3541 = vmatprep.subr.bf16.mxu0 %v3924_v1 }
 0xe14   :  { %3543 = vmatpush3.bf16.msra.mxu0 %v4129_v44 }
 0xe15   :  { %3556 = vmatprep.subr.bf16.mxu0 %v3924_v1 }
 0xeda   :  { %v971_v38 = vpop.f32.mrb[4].mxu0 }
 0xedb   :  { %v972_v39 = vadd.f32 %v4146_v49, %v971_v38  ;;  %v3187_v41 = vpop.f32.mrb[5].mxu0 }
 0xedd   :  { %3727 = vtanh.f32 %v972_v39  ;;  %v2861_v42 = vmul.f32 -1.442695, %v972_v39 }
 0xedf   :  { %3729 = vpow2.f32 %v2861_v42 }
 0xee7   :  { %v3728_v31 = vpop.eup %3727 }
 0xee8   :  { %984 = vrot.lane.b32.xlu1 %v3728_v31, %s3927_s22 }
 0xee9   :  { %v3730_v43 = vpop.eup %3729 }
 0xeea   :  { %v978_v45 = vadd.f32 1.0, %v3730_v43 }
 0xeec   :  { %3731 = vrcp.f32 %v978_v45 }
 0xef6   :  { %v3732_v46 = vpop.eup %3731 }
 0xef7   :  { %v982_v50 = vmul.f32 %v3732_v46, %v4222_v57 }
 0xf5a   :  { %v985_v47 = vpop.permute.xlu1 %984 }
 0xf5b   :  { %v987_v48 = vmul.f32 %v3732_v46, %v985_v47 }
 0xf5d   :  { %989 = vrot.lane.b32.xlu0 %v987_v48, %s3928_s3 }
 0xfcf   :  { %v990_v51 = vpop.permute.xlu0 %989 }
 0xfd0   :  { %v4274_v52 = vadd.f32 %v990_v51, %v982_v50 }
 0xfd2   :  { %3733 = vtanh.f32 %v4274_v52 }
 0xfdc   :  { %v3734_v53 = vpop.eup %3733 }
 0xfdd   :  { %995 = vrot.lane.b32.xlu1 %v3734_v53, %s3927_s22 }
 0xfe1   :  { %1081 = vrot.lane.b32.xlu1 %v1080_v54, %s3928_s3 }
0x104f   :  { %v996_v55 = vpop.permute.xlu1 %995 }
0x1050   :  { %v4279_v56 = vmul.f32 %v3732_v46, %v996_v55 }
0x1052   :  { %1000 = vrot.lane.b32.xlu0 %v4279_v56, %s3928_s3  ;;  %v1190_v24 = vrot.slane %v4279_v56, 2 }
0x1053   :  { %v1082_v57 = vpop.permute.xlu1 %1081 }
0x10c4   :  { %v1001_v58 = vpop.permute.xlu0 %1000 }
0x10c5   :  { %3197 = vmatmul.mubr.msk.f32.vlgmr.msra.gmra.mrb[12].mxu1 %vm187_vm2, %v1001_v58 }
0x10c6   :  { %3528 = vmatpush3.bf16.msra.mxu1 %v4051_v9  ;;  %3207 = vmatprep.mubr.msk.f32.mxu1 %vm3925_vm0, %v3926_v2 }
0x10c7   :  { %3529 = vmatprep.subr.bf16.mxu1 %v3924_v1 }
0x10ca   :  { %3531 = vmatpush3.bf16.msra.mxu1 %v4064_v13 }
0x10cb   :  { %3544 = vmatprep.subr.bf16.mxu1 %v3924_v1 }
0x10cd   :  { %3208 = vmatmul.mubr.msk.f32.vlgmr.msra.gmra.mrb[14].mxu1 %vm187_vm2, %v1082_v57 }
0x10ce   :  { %3546 = vmatpush3.bf16.msra.mxu1 %v4163_v4  ;;  %3237 = vmatprep.mubr.msk.f32.mxu1 %vm3925_vm0, %v3926_v2 }
0x10cf   :  { %3547 = vmatprep.subr.bf16.mxu1 %v3924_v1 }
0x10d2   :  { %3549 = vmatpush3.bf16.msra.mxu1 %v4169_v6 }
0x10d3   :  { %3550 = vmatprep.subr.bf16.mxu1 %v3924_v1 }
0x1198   :  { %v4297_v59 = vpop.f32.mrb[12].mxu1 }
0x1199   :  { %v3198_v60 = vpop.f32.mrb[13].mxu1 }
0x11a0   :  { %v1151_v63 = vpop.f32.mrb[14].mxu1 }
0x11a1   :  { %v1156_v62 = vrot.slane %v1151_v63, 2  ;;  %v3209_v3 = vpop.f32.mrb[15].mxu1 }
0x11a3   :  { %v1158_v5 = vadd.f32 %v1156_v62, %v4081_v18 }
0x11a5   :  { %3735 = vtanh.f32 %v1158_v5  ;;  %v2864_v8 = vmul.f32 -1.442695, %v1158_v5 }
0x11a7   :  { %3737 = vpow2.f32 %v2864_v8 }
0x11af   :  { %v3736_v7 = vpop.eup %3735 }
0x11b0   :  { %1171 = vrot.lane.b32.xlu0 %v3736_v7, %s3927_s22 }
0x11b1   :  { %v3738_v11 = vpop.eup %3737 }
0x11b2   :  { %v1162_v14 = vadd.f32 1.0, %v3738_v11 }
0x11b4   :  { %3739 = vrcp.f32 %v1162_v14 }
0x11be   :  { %v3740_v15 = vpop.eup %3739 }
0x11bf   :  { %v1169_v21 = vmul.f32 %v3740_v15, %v1167_v20 }
0x1222   :  { %v1172_v17 = vpop.permute.xlu0 %1171 }
0x1223   :  { %v1174_v19 = vmul.f32 %v3740_v15, %v1172_v17 }
0x1225   :  { %1176 = vrot.lane.b32.xlu1 %v1174_v19, %s3928_s3 }
0x1297   :  { %v1177_v22 = vpop.permute.xlu1 %1176 }
0x1298   :  { %v4303_v23 = vadd.f32 %v1177_v22, %v1169_v21 }
0x129a   :  { %3741 = vtanh.f32 %v4303_v23 }
0x12a4   :  { %v3742_v18 = vpop.eup %3741 }
0x12a5   :  { %1182 = vrot.lane.b32.xlu0 %v3742_v18, %s3927_s22 }
0x12a9   :  { %1191 = vrot.lane.b32.xlu0 %v1190_v24, %s3927_s22 }
0x1317   :  { %v1183_v25 = vpop.permute.xlu0 %1182 }
0x1318   :  { %v1185_v27 = vmul.f32 %v3740_v15, %v1183_v25  ;;  %v1458_v15 = vrot.slane %v4303_v23, 6 }
0x131a   :  { %1187 = vrot.lane.b32.xlu1 %v1185_v27, %s3928_s3  ;;  %v1374_v50 = vrot.slane %v1185_v27, 6 }
0x131b   :  { %v1192_v28 = vpop.permute.xlu0 %1191 }
0x138c   :  { %v1188_v29 = vpop.permute.xlu1 %1187 }
0x138d   :  { %v1194_v26 = vsel %vm187_vm2, %v1188_v29, %v1192_v28 }
0x138e   :  { %v1196_v30 = vrot.slane %v1194_v26, 6 }
0x1390   :  { %3227 = vmatmul.mubr.msk.f32.vlgmr.msra.gmra.mrb[6].mxu0 %vm297_vm3, %v1196_v30 }
0x1391   :  { %3558 = vmatpush3.bf16.msra.mxu0 %v4098_v35  ;;  %3267 = vmatprep.mubr.msk.f32.mxu0 %vm3925_vm0, %v3926_v2 }
0x1392   :  { %3559 = vmatprep.subr.bf16.mxu0 %v3924_v1 }
0x1395   :  { %3561 = vmatpush3.bf16.msra.mxu0 %v4104_v37 }
0x1396   :  { %3562 = vmatprep.subr.bf16.mxu0 %v3924_v1 }
0x1399   :  { %3564 = vmatpush3.bf16.msra.mxu0 %v4116_v40 }
0x139a   :  { %3565 = vmatprep.subr.bf16.mxu0 %v3924_v1 }
0x139d   :  { %3567 = vmatpush3.bf16.msra.mxu0 %v4129_v44 }
0x139e   :  { %3580 = vmatprep.subr.bf16.mxu0 %v3924_v1 }
0x1463   :  { %v1265_v33 = vpop.f32.mrb[6].mxu0 }
0x1464   :  { %v1266_v34 = vadd.f32 %v4146_v49, %v1265_v33  ;;  %v3228_v32 = vpop.f32.mrb[7].mxu0 }
0x1466   :  { %3743 = vtanh.f32 %v1266_v34  ;;  %v2866_v38 = vmul.f32 -1.442695, %v1266_v34 }
0x1468   :  { %3745 = vpow2.f32 %v2866_v38 }
0x1470   :  { %v3744_v36 = vpop.eup %3743 }
0x1471   :  { %1278 = vrot.lane.b32.xlu1 %v3744_v36, %s3927_s22 }
0x1472   :  { %v3746_v39 = vpop.eup %3745 }
0x1473   :  { %v1272_v41 = vadd.f32 1.0, %v3746_v39 }
0x1475   :  { %3747 = vrcp.f32 %v1272_v41 }
0x147f   :  { %v3748_v31 = vpop.eup %3747 }
0x1480   :  { %v1276_v45 = vmul.f32 %v3748_v31, %v4274_v52 }
0x14e3   :  { %v1279_v42 = vpop.permute.xlu1 %1278 }
0x14e4   :  { %v1281_v43 = vmul.f32 %v3748_v31, %v1279_v42 }
0x14e6   :  { %1283 = vrot.lane.b32.xlu0 %v1281_v43, %s3928_s3 }
0x1558   :  { %v1284_v46 = vpop.permute.xlu0 %1283 }
0x1559   :  { %v4326_v47 = vadd.f32 %v1284_v46, %v1276_v45 }
0x155b   :  { %3749 = vtanh.f32 %v4326_v47 }
0x1565   :  { %v3750_v48 = vpop.eup %3749 }
0x1566   :  { %1289 = vrot.lane.b32.xlu1 %v3750_v48, %s3927_s22 }
0x156a   :  { %1375 = vrot.lane.b32.xlu1 %v1374_v50, %s3928_s3 }
0x15d8   :  { %v1290_v51 = vpop.permute.xlu1 %1289 }
0x15d9   :  { %v4331_v53 = vmul.f32 %v3748_v31, %v1290_v51 }
0x15db   :  { %1294 = vrot.lane.b32.xlu0 %v4331_v53, %s3928_s3 }
0x15dc   :  { %v1376_v52 = vpop.permute.xlu1 %1375 }
0x164d   :  { %v1295_v54 = vpop.permute.xlu0 %1294 }
0x164e   :  { %3238 = vmatmul.mubr.msk.f32.vlgmr.msra.gmra.mrb[16].mxu1 %vm187_vm2, %v1295_v54 }
0x164f   :  { %3552 = vmatpush3.bf16.msra.mxu1 %v4051_v9  ;;  %3248 = vmatprep.mubr.msk.f32.mxu1 %vm3925_vm0, %v3926_v2 }
0x1650   :  { %3553 = vmatprep.subr.bf16.mxu1 %v3924_v1 }
0x1653   :  { %3555 = vmatpush3.bf16.msra.mxu1 %v4064_v13 }
0x1654   :  { %3568 = vmatprep.subr.bf16.mxu1 %v3924_v1 }
0x1656   :  { %3249 = vmatmul.mubr.msk.f32.vlgmr.msra.gmra.mrb[18].mxu1 %vm187_vm2, %v1376_v52 }
0x1657   :  { %3570 = vmatpush3.bf16.msra.mxu1 %v4163_v4  ;;  %3278 = vmatprep.mubr.msk.f32.mxu1 %vm3925_vm0, %v3926_v2 }
0x1658   :  { %3571 = vmatprep.subr.bf16.mxu1 %v3924_v1 }
0x165b   :  { %3573 = vmatpush3.bf16.msra.mxu1 %v4169_v6 }
0x165c   :  { %3574 = vmatprep.subr.bf16.mxu1 %v3924_v1 }
0x1721   :  { %v4349_v55 = vpop.f32.mrb[16].mxu1 }
0x1722   :  { %v3239_v58 = vpop.f32.mrb[17].mxu1 }
0x1729   :  { %v1445_v57 = vpop.f32.mrb[18].mxu1 }
0x172a   :  { %v1449_v60 = vadd.f32 %v1445_v57, %v4079_v16  ;;  %v3250_v63 = vpop.f32.mrb[19].mxu1 }
0x172c   :  { %3751 = vtanh.f32 %v1449_v60  ;;  %v2869_v3 = vmul.f32 -1.442695, %v1449_v60 }
0x172e   :  { %3753 = vpow2.f32 %v2869_v3 }
0x1736   :  { %v3752_v62 = vpop.eup %3751 }
0x1737   :  { %1462 = vrot.lane.b32.xlu0 %v3752_v62, %s3927_s22 }
0x1738   :  { %v3754_v5 = vpop.eup %3753 }
0x1739   :  { %v1453_v7 = vadd.f32 1.0, %v3754_v5 }
0x173b   :  { %3755 = vrcp.f32 %v1453_v7 }
0x1745   :  { %v3756_v8 = vpop.eup %3755 }
0x1746   :  { %v1460_v17 = vmul.f32 %v3756_v8, %v1458_v15 }
0x17a9   :  { %v1463_v11 = vpop.permute.xlu0 %1462 }
0x17aa   :  { %v1465_v14 = vmul.f32 %v3756_v8, %v1463_v11 }
0x17ac   :  { %1467 = vrot.lane.b32.xlu1 %v1465_v14, %s3928_s3 }
0x181e   :  { %v1468_v19 = vpop.permute.xlu1 %1467 }
0x181f   :  { %v4355_v20 = vadd.f32 %v1468_v19, %v1460_v17 }
0x1821   :  { %3757 = vtanh.f32 %v4355_v20  ;;  %v1747_v7 = vrot.slane %v4355_v20, 6 }
0x182b   :  { %v3758_v21 = vpop.eup %3757 }
0x182c   :  { %1473 = vrot.lane.b32.xlu0 %v3758_v21, %s3927_s22 }
0x1830   :  { %1481 = vrot.lane.b32.xlu0 %v4331_v53, %s3927_s22 }
0x189e   :  { %v1474_v22 = vpop.permute.xlu0 %1473 }
0x189f   :  { %v1476_v18 = vmul.f32 %v3756_v8, %v1474_v22 }
0x18a1   :  { %1478 = vrot.lane.b32.xlu1 %v1476_v18, %s3928_s3 }
0x18a2   :  { %v1482_v24 = vpop.permute.xlu0 %1481 }
0x1913   :  { %v1479_v25 = vpop.permute.xlu1 %1478 }
0x1914   :  { %v1484_v23 = vsel %vm187_vm2, %v1479_v25, %v1482_v24 }
0x1915   :  { %3268 = vmatmul.mubr.msk.f32.vlgmr.msra.gmra.mrb[8].mxu0 %vm297_vm3, %v1484_v23 }
0x1916   :  { %3582 = vmatpush3.bf16.msra.mxu0 %v4098_v35  ;;  %3308 = vmatprep.mubr.msk.f32.mxu0 %vm3925_vm0, %v3926_v2 }
0x1917   :  { %3583 = vmatprep.subr.bf16.mxu0 %v3924_v1 }
0x191a   :  { %3585 = vmatpush3.bf16.msra.mxu0 %v4104_v37 }
0x191b   :  { %3586 = vmatprep.subr.bf16.mxu0 %v3924_v1 }
0x191e   :  { %3588 = vmatpush3.bf16.msra.mxu0 %v4116_v40 }
0x191f   :  { %3589 = vmatprep.subr.bf16.mxu0 %v3924_v1 }
0x1922   :  { %3591 = vmatpush3.bf16.msra.mxu0 %v4129_v44 }
0x1923   :  { %3604 = vmatprep.subr.bf16.mxu0 %v3924_v1 }
0x19e8   :  { %v1554_v27 = vpop.f32.mrb[8].mxu0 }
0x19e9   :  { %v1555_v28 = vadd.f32 %v4146_v49, %v1554_v27  ;;  %v3269_v29 = vpop.f32.mrb[9].mxu0 }
0x19eb   :  { %3759 = vtanh.f32 %v1555_v28  ;;  %v2871_v30 = vmul.f32 -1.442695, %v1555_v28 }
0x19ed   :  { %3761 = vpow2.f32 %v2871_v30 }
0x19f5   :  { %v3760_v26 = vpop.eup %3759 }
0x19f6   :  { %1567 = vrot.lane.b32.xlu1 %v3760_v26, %s3927_s22 }
0x19f7   :  { %v3762_v33 = vpop.eup %3761 }
0x19f8   :  { %v1561_v34 = vadd.f32 1.0, %v3762_v33 }
0x19fa   :  { %3763 = vrcp.f32 %v1561_v34 }
0x1a04   :  { %v3764_v32 = vpop.eup %3763 }
0x1a05   :  { %v1565_v39 = vmul.f32 %v3764_v32, %v4326_v47 }
0x1a68   :  { %v1568_v36 = vpop.permute.xlu1 %1567 }
0x1a69   :  { %v1570_v38 = vmul.f32 %v3764_v32, %v1568_v36 }
0x1a6b   :  { %1572 = vrot.lane.b32.xlu0 %v1570_v38, %s3928_s3 }
0x1add   :  { %v1573_v41 = vpop.permute.xlu0 %1572 }
0x1ade   :  { %v4378_v31 = vadd.f32 %v1573_v41, %v1565_v39 }
0x1ae0   :  { %3765 = vtanh.f32 %v4378_v31 }
0x1aea   :  { %v3766_v42 = vpop.eup %3765 }
0x1aeb   :  { %1578 = vrot.lane.b32.xlu1 %v3766_v42, %s3927_s22 }
0x1b5d   :  { %v1579_v43 = vpop.permute.xlu1 %1578 }
0x1b5e   :  { %v4382_v45 = vmul.f32 %v3764_v32, %v1579_v43 }
0x1b60   :  { %1583 = vrot.lane.b32.xlu0 %v4382_v45, %s3928_s3  ;;  %v1770_v17 = vrot.slane %v4382_v45, 6 }
0x1bd2   :  { %v1584_v46 = vpop.permute.xlu0 %1583 }
0x1bd3   :  { %3279 = vmatmul.mubr.msk.f32.vlgmr.msra.gmra.mrb[20].mxu1 %vm187_vm2, %v1584_v46 }
0x1bd4   :  { %3576 = vmatpush3.bf16.msra.mxu1 %v4051_v9  ;;  %3289 = vmatprep.mubr.msk.f32.mxu1 %vm3925_vm0, %v3926_v2 }
0x1bd5   :  { %3577 = vmatprep.subr.bf16.mxu1 %v3924_v1 }
0x1bd8   :  { %3579 = vmatpush3.bf16.msra.mxu1 %v4064_v13 }
0x1bd9   :  { %3592 = vmatprep.subr.bf16.mxu1 %v3924_v1 }
0x1bdb   :  { %3290 = vmatmul.mubr.msk.f32.vlgmr.msra.gmra.mrb[22].mxu1 %vm187_vm2, %v1479_v25 }
0x1bdc   :  { %3594 = vmatpush3.bf16.msra.mxu1 %v4163_v4  ;;  %3319 = vmatprep.mubr.msk.f32.mxu1 %vm3925_vm0, %v3926_v2 }
0x1bdd   :  { %3595 = vmatprep.subr.bf16.mxu1 %v3924_v1 }
0x1be0   :  { %3597 = vmatpush3.bf16.msra.mxu1 %v4169_v6 }
0x1be1   :  { %3598 = vmatprep.subr.bf16.mxu1 %v3924_v1 }
0x1ca6   :  { %v4400_v47 = vpop.f32.mrb[20].mxu1 }
0x1ca7   :  { %v3280_v48 = vpop.f32.mrb[21].mxu1 }
0x1cae   :  { %v1731_v50 = vpop.f32.mrb[22].mxu1 }
0x1caf   :  { %v1736_v51 = vrot.slane %v1731_v50, 6  ;;  %v3291_v54 = vpop.f32.mrb[23].mxu1 }
0x1cb1   :  { %v1738_v52 = vadd.f32 %v1736_v51, %v4079_v16 }
0x1cb3   :  { %3767 = vtanh.f32 %v1738_v52  ;;  %v2874_v57 = vmul.f32 -1.442695, %v1738_v52 }
0x1cb5   :  { %3769 = vpow2.f32 %v2874_v57 }
0x1cbd   :  { %v3768_v58 = vpop.eup %3767 }
0x1cbe   :  { %1751 = vrot.lane.b32.xlu1 %v3768_v58, %s3927_s22 }
0x1cbf   :  { %v3770_v60 = vpop.eup %3769 }
0x1cc0   :  { %v1742_v63 = vadd.f32 1.0, %v3770_v60 }
0x1cc2   :  { %3771 = vrcp.f32 %v1742_v63 }
0x1ccc   :  { %v3772_v62 = vpop.eup %3771 }
0x1ccd   :  { %v1749_v8 = vmul.f32 %v3772_v62, %v1747_v7 }
0x1d30   :  { %v1752_v3 = vpop.permute.xlu1 %1751 }
0x1d31   :  { %v1754_v5 = vmul.f32 %v3772_v62, %v1752_v3 }
0x1d33   :  { %1756 = vrot.lane.b32.xlu0 %v1754_v5, %s3928_s3 }
0x1da5   :  { %v1757_v11 = vpop.permute.xlu0 %1756 }
0x1da6   :  { %v4406_v14 = vadd.f32 %v1757_v11, %v1749_v8 }
0x1da8   :  { %3773 = vtanh.f32 %v4406_v14  ;;  %v2041_v11 = vrot.slane %v4406_v14, 6 }
0x1db2   :  { %v3774_v15 = vpop.eup %3773 }
0x1db3   :  { %1762 = vrot.lane.b32.xlu1 %v3774_v15, %s3927_s22 }
0x1db7   :  { %1771 = vrot.lane.b32.xlu1 %v1770_v17, %s3927_s22 }
0x1e25   :  { %v1763_v19 = vpop.permute.xlu1 %1762 }
0x1e26   :  { %v1765_v21 = vmul.f32 %v3772_v62, %v1763_v19 }
0x1e28   :  { %1767 = vrot.lane.b32.xlu0 %v1765_v21, %s3928_s3  ;;  %v1954_v42 = vrot.slane %v1765_v21, 2 }
0x1e29   :  { %v1772_v22 = vpop.permute.xlu1 %1771 }
0x1e9a   :  { %v1768_v18 = vpop.permute.xlu0 %1767 }
0x1e9b   :  { %v1774_v20 = vsel %vm187_vm2, %v1768_v18, %v1772_v22 }
0x1e9c   :  { %v1776_v24 = vrot.slane %v1774_v20, 2 }
0x1e9e   :  { %3309 = vmatmul.mubr.msk.f32.vlgmr.msra.gmra.mrb[10].mxu0 %vm297_vm3, %v1776_v24 }
0x1e9f   :  { %3606 = vmatpush3.bf16.msra.mxu0 %v4098_v35  ;;  %3349 = vmatprep.mubr.msk.f32.mxu0 %vm3925_vm0, %v3926_v2 }
0x1ea0   :  { %3607 = vmatprep.subr.bf16.mxu0 %v3924_v1 }
0x1ea3   :  { %3609 = vmatpush3.bf16.msra.mxu0 %v4104_v37 }
0x1ea4   :  { %3610 = vmatprep.subr.bf16.mxu0 %v3924_v1 }
0x1ea7   :  { %3612 = vmatpush3.bf16.msra.mxu0 %v4116_v40 }
0x1ea8   :  { %3613 = vmatprep.subr.bf16.mxu0 %v3924_v1 }
0x1eab   :  { %3615 = vmatpush3.bf16.msra.mxu0 %v4129_v44 }
0x1eac   :  { %3628 = vmatprep.subr.bf16.mxu0 %v3924_v1 }
0x1f71   :  { %v1845_v25 = vpop.f32.mrb[10].mxu0 }
0x1f72   :  { %v1846_v23 = vadd.f32 %v4146_v49, %v1845_v25  ;;  %v3310_v27 = vpop.f32.mrb[11].mxu0 }
0x1f74   :  { %3775 = vtanh.f32 %v1846_v23  ;;  %v2876_v29 = vmul.f32 -1.442695, %v1846_v23 }
0x1f76   :  { %3777 = vpow2.f32 %v2876_v29 }
0x1f7e   :  { %v3776_v28 = vpop.eup %3775 }
0x1f7f   :  { %1858 = vrot.lane.b32.xlu0 %v3776_v28, %s3927_s22 }
0x1f80   :  { %v3778_v26 = vpop.eup %3777 }
0x1f81   :  { %v1852_v30 = vadd.f32 1.0, %v3778_v26 }
0x1f83   :  { %3779 = vrcp.f32 %v1852_v30 }
0x1f8d   :  { %v3780_v33 = vpop.eup %3779 }
0x1f8e   :  { %v1856_v36 = vmul.f32 %v3780_v33, %v4378_v31 }
0x1ff1   :  { %v1859_v34 = vpop.permute.xlu0 %1858 }
0x1ff2   :  { %v1861_v32 = vmul.f32 %v3780_v33, %v1859_v34 }
0x1ff4   :  { %1863 = vrot.lane.b32.xlu1 %v1861_v32, %s3928_s3 }
0x2066   :  { %v1864_v38 = vpop.permute.xlu1 %1863 }
0x2067   :  { %v4429_v39 = vadd.f32 %v1864_v38, %v1856_v36 }
0x2069   :  { %3781 = vtanh.f32 %v4429_v39 }
0x2073   :  { %v3782_v41 = vpop.eup %3781 }
0x2074   :  { %1869 = vrot.lane.b32.xlu0 %v3782_v41, %s3927_s22 }
0x2078   :  { %1955 = vrot.lane.b32.xlu0 %v1954_v42, %s3928_s3 }
0x20e6   :  { %v1870_v43 = vpop.permute.xlu0 %1869 }
0x20e7   :  { %v4434_v46 = vmul.f32 %v3780_v33, %v1870_v43 }
0x20e9   :  { %1874 = vrot.lane.b32.xlu1 %v4434_v46, %s3928_s3  ;;  %v2064_v22 = vrot.slane %v4434_v46, 4 }
0x20ea   :  { %v1956_v31 = vpop.permute.xlu0 %1955 }
0x215b   :  { %v1875_v48 = vpop.permute.xlu1 %1874 }
0x215c   :  { %3320 = vmatmul.mubr.msk.f32.vlgmr.msra.gmra.mrb[24].mxu1 %vm187_vm2, %v1875_v48 }
0x215d   :  { %3600 = vmatpush3.bf16.msra.mxu1 %v4051_v9  ;;  %3330 = vmatprep.mubr.msk.f32.mxu1 %vm3925_vm0, %v3926_v2 }
0x215e   :  { %3601 = vmatprep.subr.bf16.mxu1 %v3924_v1 }
0x2161   :  { %3603 = vmatpush3.bf16.msra.mxu1 %v4064_v13 }
0x2162   :  { %3616 = vmatprep.subr.bf16.mxu1 %v3924_v1 }
0x2164   :  { %3331 = vmatmul.mubr.msk.f32.vlgmr.msra.gmra.mrb[26].mxu1 %vm187_vm2, %v1956_v31 }
0x2165   :  { %3618 = vmatpush3.bf16.msra.mxu1 %v4163_v4  ;;  %3360 = vmatprep.mubr.msk.f32.mxu1 %vm3925_vm0, %v3926_v2 }
0x2166   :  { %3619 = vmatprep.subr.bf16.mxu1 %v3924_v1 }
0x2169   :  { %3621 = vmatpush3.bf16.msra.mxu1 %v4169_v6 }
0x216a   :  { %3622 = vmatprep.subr.bf16.mxu1 %v3924_v1 }
0x222f   :  { %v4452_v50 = vpop.f32.mrb[24].mxu1 }
0x2230   :  { %v3321_v51 = vpop.f32.mrb[25].mxu1 }
0x2237   :  { %v2025_v54 = vpop.f32.mrb[26].mxu1 }
0x2238   :  { %v2030_v52 = vrot.slane %v2025_v54, 4  ;;  %v3332_v58 = vpop.f32.mrb[27].mxu1 }
0x223a   :  { %v2032_v57 = vadd.f32 %v2030_v52, %v4079_v16 }
0x223c   :  { %3783 = vtanh.f32 %v2032_v57  ;;  %v2879_v63 = vmul.f32 -1.442695, %v2032_v57 }
0x223e   :  { %3785 = vpow2.f32 %v2879_v63 }
0x2246   :  { %v3784_v60 = vpop.eup %3783 }
0x2247   :  { %2045 = vrot.lane.b32.xlu1 %v3784_v60, %s3927_s22 }
0x2248   :  { %v3786_v62 = vpop.eup %3785 }
0x2249   :  { %v2036_v3 = vadd.f32 1.0, %v3786_v62 }
0x224b   :  { %3787 = vrcp.f32 %v2036_v3 }
0x2255   :  { %v3788_v5 = vpop.eup %3787 }
0x2256   :  { %v2043_v15 = vmul.f32 %v3788_v5, %v2041_v11 }
0x22b9   :  { %v2046_v7 = vpop.permute.xlu1 %2045 }
0x22ba   :  { %v2048_v8 = vmul.f32 %v3788_v5, %v2046_v7 }
0x22bc   :  { %2050 = vrot.lane.b32.xlu0 %v2048_v8, %s3928_s3 }
0x232e   :  { %v2051_v17 = vpop.permute.xlu0 %2050 }
0x232f   :  { %v4458_v19 = vadd.f32 %v2051_v17, %v2043_v15 }
0x2331   :  { %3789 = vtanh.f32 %v4458_v19  ;;  %v2335_v62 = vrot.slane %v4458_v19, 6 }
0x233b   :  { %v3790_v21 = vpop.eup %3789 }
0x233c   :  { %2056 = vrot.lane.b32.xlu1 %v3790_v21, %s3927_s22 }
0x2340   :  { %2065 = vrot.lane.b32.xlu1 %v2064_v22, %s3927_s22 }
0x23ae   :  { %v2057_v18 = vpop.permute.xlu1 %2056 }
0x23af   :  { %v2059_v20 = vmul.f32 %v3788_v5, %v2057_v18 }
0x23b1   :  { %2061 = vrot.lane.b32.xlu0 %v2059_v20, %s3928_s3  ;;  %v2248_v38 = vrot.slane %v2059_v20, 4  ;;  %v3849_v20 = vld [vmem:[%s4648_s5] ss:$0 sm:$0xff] }
0x23b2   :  { %v2066_v24 = vpop.permute.xlu1 %2065 }
0x2423   :  { %v2062_v25 = vpop.permute.xlu0 %2061 }
0x2424   :  { %v2068_v14 = vsel %vm187_vm2, %v2062_v25, %v2066_v24 }
0x2425   :  { %v2070_v23 = vrot.slane %v2068_v14, 4 }
0x2427   :  { %3350 = vmatmul.mubr.msk.f32.vlgmr.msra.gmra.mrb[12].mxu0 %vm297_vm3, %v2070_v23 }
0x2428   :  { %3630 = vmatpush3.bf16.msra.mxu0 %v4098_v35  ;;  %3390 = vmatprep.mubr.msk.f32.mxu0 %vm3925_vm0, %v3926_v2 }
0x2429   :  { %3631 = vmatprep.subr.bf16.mxu0 %v3924_v1 }
0x242c   :  { %3633 = vmatpush3.bf16.msra.mxu0 %v4104_v37 }
0x242d   :  { %3634 = vmatprep.subr.bf16.mxu0 %v3924_v1 }
0x2430   :  { %3636 = vmatpush3.bf16.msra.mxu0 %v4116_v40 }
0x2431   :  { %3637 = vmatprep.subr.bf16.mxu0 %v3924_v1 }
0x2434   :  { %3639 = vmatpush3.bf16.msra.mxu0 %v4129_v44 }
0x2435   :  { %3652 = vmatprep.subr.bf16.mxu0 %v3924_v1 }
0x24fa   :  { %v2139_v27 = vpop.f32.mrb[12].mxu0 }
0x24fb   :  { %v2140_v35 = vadd.f32 %v4146_v49, %v2139_v27  ;;  %v3351_v28 = vpop.f32.mrb[13].mxu0 }
0x24fd   :  { %3791 = vtanh.f32 %v2140_v35  ;;  %v2881_v26 = vmul.f32 -1.442695, %v2140_v35 }
0x24ff   :  { %3793 = vpow2.f32 %v2881_v26 }
0x2507   :  { %v3792_v29 = vpop.eup %3791 }
0x2508   :  { %2152 = vrot.lane.b32.xlu0 %v3792_v29, %s3927_s22 }
0x2509   :  { %v3794_v37 = vpop.eup %3793 }
0x250a   :  { %v2146_v30 = vadd.f32 1.0, %v3794_v37 }
0x250c   :  { %3795 = vrcp.f32 %v2146_v30 }
0x2516   :  { %v3796_v40 = vpop.eup %3795 }
0x2517   :  { %v2150_v44 = vmul.f32 %v3796_v40, %v4429_v39 }
0x257a   :  { %v2153_v33 = vpop.permute.xlu0 %2152 }
0x257b   :  { %v2155_v34 = vmul.f32 %v3796_v40, %v2153_v33 }
0x257d   :  { %2157 = vrot.lane.b32.xlu1 %v2155_v34, %s3928_s3  ;;  %v2849_v34 = vld [vmem:[#allocation3] ss:$0 sm:$0xff] }
0x25ef   :  { %v2158_v32 = vpop.permute.xlu1 %2157 }
0x25f0   :  { %v4481_v36 = vadd.f32 %v2158_v32, %v2150_v44  ;;  %v473_v44 = vadd.f32 %v2849_v34, %v4193_v12  ;;  %v1071_v32 = vadd.f32 %v2849_v34, %v4297_v59 }
0x25f2   :  { %3797 = vtanh.f32 %v4481_v36 }
0x25fc   :  { %v3798_v49 = vpop.eup %3797 }
0x25fd   :  { %2163 = vrot.lane.b32.xlu0 %v3798_v49, %s3927_s22  ;;  %v1365_v49 = vadd.f32 %v2849_v34, %v4349_v55 }
0x2601   :  { %2249 = vrot.lane.b32.xlu0 %v2248_v38, %s3928_s3  ;;  %v1945_v38 = vadd.f32 %v2849_v34, %v4452_v50 }
0x266f   :  { %v2164_v41 = vpop.permute.xlu0 %2163 }
0x2670   :  { %v4486_v42 = vmul.f32 %v3796_v40, %v2164_v41 }
0x2672   :  { %2168 = vrot.lane.b32.xlu1 %v4486_v42, %s3928_s3  ;;  %v2358_v8 = vrot.slane %v4486_v42, 2 }
0x2673   :  { %v2250_v39 = vpop.permute.xlu0 %2249 }
0x26e4   :  { %v2169_v43 = vpop.permute.xlu1 %2168 }
0x26e5   :  { %3361 = vmatmul.mubr.msk.f32.vlgmr.msra.gmra.mrb[28].mxu1 %vm187_vm2, %v2169_v43 }
0x26e6   :  { %3624 = vmatpush3.bf16.msra.mxu1 %v4051_v9  ;;  %3371 = vmatprep.mubr.msk.f32.mxu1 %vm3925_vm0, %v3926_v2 }
0x26e7   :  { %3625 = vmatprep.subr.bf16.mxu1 %v3924_v1 }
0x26ea   :  { %3627 = vmatpush3.bf16.msra.mxu1 %v4064_v13 }
0x26eb   :  { %3640 = vmatprep.subr.bf16.mxu1 %v3924_v1 }
0x26ed   :  { %3372 = vmatmul.mubr.msk.f32.vlgmr.msra.gmra.mrb[30].mxu1 %vm187_vm2, %v2250_v39 }
0x26ee   :  { %3642 = vmatpush3.bf16.msra.mxu1 %v4163_v4  ;;  %3401 = vmatprep.mubr.msk.f32.mxu1 %vm3925_vm0, %v3926_v2 }
0x26ef   :  { %3643 = vmatprep.subr.bf16.mxu1 %v3924_v1 }
0x26f2   :  { %3645 = vmatpush3.bf16.msra.mxu1 %v4169_v6 }
0x26f3   :  { %3646 = vmatprep.subr.bf16.mxu1 %v3924_v1 }
0x27b8   :  { %v4504_v9 = vpop.f32.mrb[28].mxu1 }
0x27b9   :  { %v3362_v48 = vpop.f32.mrb[29].mxu1 }
0x27c0   :  { %v2319_v13 = vpop.f32.mrb[30].mxu1 }
0x27c1   :  { %v2324_v31 = vrot.slane %v2319_v13, 2  ;;  %v3373_v51 = vpop.f32.mrb[31].mxu1 }
0x27c3   :  { %v2326_v54 = vadd.f32 %v2324_v31, %v4079_v16 }
0x27c5   :  { %3799 = vtanh.f32 %v2326_v54  ;;  %v2884_v4 = vmul.f32 -1.442695, %v2326_v54 }
0x27c7   :  { %3801 = vpow2.f32 %v2884_v4 }
0x27cf   :  { %v3800_v52 = vpop.eup %3799 }
0x27d0   :  { %2339 = vrot.lane.b32.xlu1 %v3800_v52, %s3927_s22 }
0x27d1   :  { %v3802_v58 = vpop.eup %3801 }
0x27d2   :  { %v2330_v57 = vadd.f32 1.0, %v3802_v58  ;;  %v777_v58 = vadd.f32 %v2849_v34, %v4245_v0 }
0x27d4   :  { %3803 = vrcp.f32 %v2330_v57  ;;  %v1654_v57 = vadd.f32 %v2849_v34, %v4400_v47 }
0x27de   :  { %v3804_v6 = vpop.eup %3803 }
0x27df   :  { %v2337_v3 = vmul.f32 %v3804_v6, %v2335_v62 }
0x2842   :  { %v2340_v60 = vpop.permute.xlu1 %2339 }
0x2843   :  { %v2342_v63 = vmul.f32 %v3804_v6, %v2340_v60 }
0x2845   :  { %2344 = vrot.lane.b32.xlu0 %v2342_v63, %s3928_s3 }
0x28b7   :  { %v2345_v5 = vpop.permute.xlu0 %2344 }
0x28b8   :  { %v2347_v7 = vadd.f32 %v2345_v5, %v2337_v3 }
0x28ba   :  { %3805 = vtanh.f32 %v2347_v7 }
0x28c4   :  { %v3806_v16 = vpop.eup %3805 }
0x28c5   :  { %2350 = vrot.lane.b32.xlu1 %v3806_v16, %s3927_s22 }
0x28c9   :  { %2359 = vrot.lane.b32.xlu1 %v2358_v8, %s3927_s22 }
0x2937   :  { %v2351_v11 = vpop.permute.xlu1 %2350 }
0x2938   :  { %v2353_v15 = vmul.f32 %v3804_v6, %v2351_v11  ;;  %v2239_v6 = vadd.f32 %v2849_v34, %v4504_v9 }
0x293a   :  { %2355 = vrot.lane.b32.xlu0 %v2353_v15, %s3928_s3 }
0x293b   :  { %v2360_v17 = vpop.permute.xlu1 %2359 }
0x29ac   :  { %v2356_v21 = vpop.permute.xlu0 %2355 }
0x29ad   :  { %v2362_v22 = vsel %vm187_vm2, %v2356_v21, %v2360_v17 }
0x29ae   :  { %v2364_v19 = vrot.slane %v2362_v22, 6 }
0x29b0   :  { %3391 = vmatmul.mubr.msk.f32.vlgmr.msra.gmra.mrb[14].mxu0 %vm297_vm3, %v2364_v19  ;;  %v3929_v19 = vmov 0  }
0x29b1   :  { %3447 = vmatprep.mubr.msk.f32.mxu0 %vm3925_vm0, %v3926_v2  ;;  %3686 = vset.pattern.permute.xlu0 %v3929_v19 }
0x29b2   :  { %3685 = vset.pattern.permute.xlu1 %v3929_v19 }
0x2a83   :  { %v2433_v18 = vpop.f32.mrb[14].mxu0 }
0x2a84   :  { %v2434_v24 = vadd.f32 %v3849_v20, %v2433_v18  ;;  %v3392_v25 = vpop.f32.mrb[15].mxu0 }
0x2a86   :  { %3807 = vtanh.f32 %v2434_v24  ;;  %v2886_v23 = vmul.f32 -1.442695, %v2434_v24  ;;  %v2852_v24 = vld [vmem:[#allocation2] ss:$0 sm:$0xff] }
0x2a88   :  { %3809 = vpow2.f32 %v2886_v23 }
0x2a90   :  { %v3808_v14 = vpop.eup %3807 }
0x2a91   :  { %2446 = vrot.lane.b32.xlu0 %v3808_v14, %s3927_s22 }
0x2a92   :  { %v3810_v27 = vpop.eup %3809 }
0x2a93   :  { %v2440_v35 = vadd.f32 1.0, %v3810_v27 }
0x2a95   :  { %3811 = vrcp.f32 %v2440_v35 }
0x2a9f   :  { %v3812_v28 = vpop.eup %3811 }
0x2aa0   :  { %v2444_v37 = vmul.f32 %v3812_v28, %v4481_v36  ;;  %v2851_v36 = vld [vmem:[%s4651_s8] ss:$0 sm:$0xff] }
0x2b03   :  { %v2447_v29 = vpop.permute.xlu0 %2446 }
0x2b04   :  { %v2449_v26 = vmul.f32 %v3812_v28, %v2447_v29 }
0x2b06   :  { %2451 = vrot.lane.b32.xlu1 %v2449_v26, %s3928_s3 }
0x2b78   :  { %v2452_v30 = vpop.permute.xlu1 %2451 }
0x2b79   :  { %v2454_v40 = vadd.f32 %v2452_v30, %v2444_v37 }
0x2b7b   :  { %3813 = vtanh.f32 %v2454_v40 }
0x2b7c   :  { %3815 = vtanh.f32 %v473_v44 }
0x2b7d   :  { %3817 = vtanh.f32 %v1071_v32 }
0x2b7e   :  { %3819 = vtanh.f32 %v1365_v49 }
0x2b7f   :  { %3821 = vtanh.f32 %v1945_v38 }
0x2b80   :  { %3823 = vtanh.f32 %v777_v58 }
0x2b81   :  { %3825 = vtanh.f32 %v1654_v57 }
0x2b82   :  { %3827 = vtanh.f32 %v2239_v6 }
0x2b85   :  { %v3814_v33 = vpop.eup %3813 }
0x2b86   :  { %2457 = vrot.lane.b32.xlu0 %v3814_v33, %s3927_s22  ;;  %v3816_v41 = vpop.eup %3815 }
0x2b87   :  { %v483_v43 = vmul.f32 %v3816_v41, %v2851_v36  ;;  %v3818_v39 = vpop.eup %3817 }
0x2b88   :  { %v1075_v48 = vmul.f32 %v3818_v39, %v2851_v36  ;;  %v3820_v13 = vpop.eup %3819 }
0x2b89   :  { %v485_v12 = vsel %vm484_vm4, %v483_v43, 0.0  ;;  %v1369_v55 = vmul.f32 %v3820_v13, %v2851_v36  ;;  %v3822_v31 = vpop.eup %3821 }
0x2b8a   :  { %v1076_v59 = vsel %vm484_vm4, %v1075_v48, 0.0  ;;  %v1949_v51 = vmul.f32 %v3822_v31, %v2851_v36  ;;  %v3824_v60 = vpop.eup %3823 }
0x2b8b   :  { %v1370_v50 = vsel %vm484_vm4, %v1369_v55, 0.0  ;;  %v781_v63 = vmul.f32 %v3824_v60, %v2851_v36  ;;  %v3826_v62 = vpop.eup %3825 }
0x2b8c   :  { %v1950_v54 = vsel %vm484_vm4, %v1949_v51, 0.0  ;;  %v1658_v5 = vmul.f32 %v3826_v62, %v2851_v36  ;;  %v3828_v7 = vpop.eup %3827 }
0x2b8d   :  { %v782_v3 = vsel %vm484_vm4, %v781_v63, 0.0  ;;  %v2243_v8 = vmul.f32 %v3828_v7, %v2851_v36 }
0x2b8e   :  { %v1659_v16 = vsel %vm484_vm4, %v1658_v5, 0.0 }
0x2b8f   :  { %v2244_v0 = vsel %vm484_vm4, %v2243_v8, 0.0 }
0x2ba5   :  { %486 = vadd.xlane.f32.xlu0 %v485_v12 }
0x2ba9   :  { %1077 = vadd.xlane.f32.xlu0 %v1076_v59 }
0x2bad   :  { %1371 = vadd.xlane.f32.xlu0 %v1370_v50 }
0x2bb1   :  { %1951 = vadd.xlane.f32.xlu0 %v1950_v54 }
0x2bf8   :  { %v2458_v52 = vpop.permute.xlu0 %2457 }
0x2bf9   :  { %v4536_v4 = vmul.f32 %v3812_v28, %v2458_v52 }
0x2bfb   :  { %2462 = vrot.lane.b32.xlu1 %v4536_v4, %s3928_s3 }
0x2c1f   :  { %783 = vadd.xlane.f32.xlu1 %v782_v3 }
0x2c23   :  { %1660 = vadd.xlane.f32.xlu1 %v1659_v16 }
0x2c27   :  { %2245 = vadd.xlane.f32.xlu1 %v2244_v0 }
0x2c32   :  { %v487_v18 = vpop.xlane.xlu0 %486 }
0x2c33   :  { %v494_v23 = vadd.f32 %v2852_v24, %v487_v18 }
0x2c36   :  { %v1078_v14 = vpop.xlane.xlu0 %1077 }
0x2c3a   :  { %v1372_v35 = vpop.xlane.xlu0 %1371 }
0x2c3b   :  { %v1373_v29 = vadd.f32 %v2852_v24, %v1372_v35 }
0x2c3e   :  { %v1952_v40 = vpop.xlane.xlu0 %1951 }
0x2c6d   :  { %v2463_v47 = vpop.permute.xlu1 %2462 }
0x2c6e   :  { %3402 = vmatmul.mubr.msk.f32.vlgmr.msra.gmra.mrb[32].mxu1 %vm187_vm2, %v2463_v47 }
0x2c6f   :  { %3412 = vmatprep.mubr.msk.f32.mxu1 %vm3925_vm0, %v3926_v2  ;;  %v1079_v2 = vadd.f32 %v2852_v24, %v1078_v14 }
0x2cac   :  { %v784_v20 = vpop.xlane.xlu1 %783 }
0x2cad   :  { %v785_v25 = vadd.f32 %v2852_v24, %v784_v20 }
0x2caf   :  { %v2542_v27 = vmax.f32 %v494_v23, %v785_v25 }
0x2cb0   :  { %v1661_v26 = vpop.xlane.xlu1 %1660 }
0x2cb1   :  { %v2543_v28 = vmax.f32 %v2542_v27, %v1079_v2  ;;  %v1662_v30 = vadd.f32 %v2852_v24, %v1661_v26  ;;  %v2646_v26 = vld [vmem:[%s4653_s10 + $0x10] sm:$0xff] }
0x2cb3   :  { %v2544_v37 = vmax.f32 %v2543_v28, %v1373_v29  ;;  %v2644_v28 = vld [vmem:[%s4653_s10] sm:$0xff] }
0x2cb4   :  { %v2246_v44 = vpop.xlane.xlu1 %2245 }
0x2cb5   :  { %v2545_v33 = vmax.f32 %v2544_v37, %v1662_v30  ;;  %v2247_v49 = vadd.f32 %v2852_v24, %v2246_v44 }
0x2d41   :  { %v2532_v9 = vpop.f32.mrb[32].mxu1 }
0x2d42   :  { %v2533_v11 = vadd.f32 %v2849_v34, %v2532_v9  ;;  %v3403_v15 = vpop.f32.mrb[33].mxu1  ;;  %v1953_v34 = vadd.f32 %v2852_v24, %v1952_v40 }
0x2d44   :  { %3829 = vtanh.f32 %v2533_v11  ;;  %v2546_v32 = vmax.f32 %v2545_v33, %v1953_v34 }
0x2d46   :  { %v2547_v41 = vmax.f32 %v2546_v32, %v2247_v49 }
0x2d4e   :  { %v3830_v17 = vpop.eup %3829 }
0x2d4f   :  { %v2537_v21 = vmul.f32 %v3830_v17, %v2851_v36 }
0x2d51   :  { %v2538_v22 = vsel %vm484_vm4, %v2537_v21, 0.0 }
0x2d52   :  { %2539 = vadd.xlane.f32.xlu0 %v2538_v22 }
0x2ddf   :  { %v2540_v38 = vpop.xlane.xlu0 %2539 }
0x2de0   :  { %v2541_v36 = vadd.f32 %v2852_v24, %v2540_v38 }
0x2de2   :  { %v2548_v43 = vmax.f32 %v2547_v41, %v2541_v36 }
0x2de4   :  { %v2549_v39 = vsub.f32 %v494_v23, %v2548_v43  ;;  %v2552_v12 = vsub.f32 %v785_v25, %v2548_v43  ;;  %v2555_v48 = vsub.f32 %v1079_v2, %v2548_v43  ;;  %v2558_v13 = vsub.f32 %v1373_v29, %v2548_v43  ;;  %v2645_v29 = vld [vmem:[%s4653_s10 + $0x8] sm:$0xff] }
0x2de5   :  { %v2561_v50 = vsub.f32 %v1662_v30, %v2548_v43  ;;  %v2564_v54 = vsub.f32 %v1953_v34, %v2548_v43  ;;  %v2567_v58 = vsub.f32 %v2247_v49, %v2548_v43  ;;  %v2570_v6 = vsub.f32 %v2541_v36, %v2548_v43  ;;  %v2647_v30 = vld [vmem:[%s4653_s10 + $0x18] sm:$0xff] }
0x2de6   :  { %v2550_v59 = vmul.f32 1.442695, %v2549_v39  ;;  %v2553_v55 = vmul.f32 1.442695, %v2552_v12  ;;  %v2556_v31 = vmul.f32 1.442695, %v2555_v48  ;;  %v3647_v37 = vpack.c.bf16 %v2645_v29, %v2644_v28 }
0x2de7   :  { %v2559_v51 = vmul.f32 1.442695, %v2558_v13  ;;  %v2562_v52 = vmul.f32 1.442695, %v2561_v50  ;;  %v2565_v57 = vmul.f32 1.442695, %v2564_v54  ;;  %v3650_v40 = vpack.c.bf16 %v2647_v30, %v2646_v26 }
0x2de8   :  { %3831 = vpow2.f32 %v2550_v59  ;;  %v2568_v60 = vmul.f32 1.442695, %v2567_v58  ;;  %v2571_v63 = vmul.f32 1.442695, %v2570_v6  ;;  %3648 = vmatpush3.bf16.msra.mxu1 %v3647_v37  ;;  %v2731_v48 = vld [vmem:[%s4655_s12] sm:$0xff]  ;;  %v2732_v13 = vld [vmem:[%s4655_s12 + $0x8] sm:$0xff] }
0x2de9   :  { %3833 = vpow2.f32 %v2553_v55  ;;  %3649 = vmatprep.subr.bf16.mxu1 %v3924_v1  ;;  %v2735_v54 = vld [vmem:[%s4655_s12 + $0x20] sm:$0xff] }
0x2dea   :  { %3835 = vpow2.f32 %v2556_v31 }
0x2deb   :  { %3837 = vpow2.f32 %v2559_v51 }
0x2dec   :  { %3839 = vpow2.f32 %v2562_v52  ;;  %3651 = vmatpush3.bf16.msra.mxu1 %v3650_v40 }
0x2ded   :  { %3841 = vpow2.f32 %v2565_v57 }
0x2dee   :  { %3843 = vpow2.f32 %v2568_v60  ;;  %v2737_v60 = vld [vmem:[%s4655_s12 + $0x30] sm:$0xff] }
0x2def   :  { %3845 = vpow2.f32 %v2571_v63  ;;  %v2738_v63 = vld [vmem:[%s4655_s12 + $0x38] sm:$0xff] }
0x2df2   :  { %v3832_v62 = vpop.eup %3831 }
0x2df3   :  { %v3834_v3 = vpop.eup %3833 }
0x2df4   :  { %v2573_v5 = vadd.f32 %v3834_v3, %v3832_v62  ;;  %v3836_v7 = vpop.eup %3835 }
0x2df5   :  { %v3838_v8 = vpop.eup %3837 }
0x2df6   :  { %v2574_v16 = vadd.f32 %v3836_v7, %v2573_v5  ;;  %v3840_v47 = vpop.eup %3839 }
0x2df7   :  { %v3842_v11 = vpop.eup %3841 }
0x2df8   :  { %v2575_v0 = vadd.f32 %v3838_v8, %v2574_v16  ;;  %v3844_v17 = vpop.eup %3843  ;;  %v2740_v16 = vld [vmem:[%s4655_s12 + $0x48] sm:$0xff] }
0x2df9   :  { %v3846_v22 = vpop.eup %3845 }
0x2dfa   :  { %v2576_v9 = vadd.f32 %v3840_v47, %v2575_v0  ;;  %v2742_v0 = vld [vmem:[%s4655_s12 + $0x58] sm:$0xff] }
0x2dfc   :  { %v2577_v15 = vadd.f32 %v3842_v11, %v2576_v9  ;;  %v2743_v9 = vld [vmem:[%s4655_s12 + $0x60] sm:$0xff] }
0x2dfe   :  { %v2578_v21 = vadd.f32 %v3844_v17, %v2577_v15 }
0x2e00   :  { %v2579_v19 = vadd.f32 %v3846_v22, %v2578_v21  ;;  %v2745_v21 = vld [vmem:[%s4655_s12 + $0x70] sm:$0xff] }
0x2e02   :  { %3847 = vrcp.f32 %v2579_v19 }
0x2e0c   :  { %v3848_v18 = vpop.eup %3847 }
0x2e0d   :  { %v2588_v20 = vmul.f32 %v3848_v18, %v3834_v3  ;;  %v2581_v24 = vmul.f32 %v3848_v18, %v3832_v62  ;;  %v2596_v25 = vmul.f32 %v3848_v18, %v3836_v7  ;;  %v2604_v14 = vmul.f32 %v3848_v18, %v3838_v8  ;;  %v2739_v7 = vld [vmem:[%s4655_s12 + $0x40] sm:$0xff] }
0x2e0e   :  { %v2612_v23 = vmul.f32 %v3848_v18, %v3840_v47  ;;  %v2620_v27 = vmul.f32 %v3848_v18, %v3842_v11  ;;  %v2628_v2 = vmul.f32 %v3848_v18, %v3844_v17  ;;  %v2636_v35 = vmul.f32 %v3848_v18, %v3846_v22  ;;  %v2744_v11 = vld [vmem:[%s4655_s12 + $0x68] sm:$0xff]  ;;  %v2746_v22 = vld [vmem:[%s4655_s12 + $0x78] sm:$0xff]  ;;  %v2888_v18 = vld [vmem:[#allocation6] ss:$0 sm:$0xff] }
0x2e0f   :  { %2591 = vperm.xlu0 %3686, %v2588_v20   ;;  %2584 = vperm.xlu1 %3685, %v2581_v24   ;;  %v3665_v8 = vpack.c.bf16 %v2740_v16, %v2739_v7  ;;  %v3671_v15 = vpack.c.bf16 %v2744_v11, %v2743_v9  ;;  %v3674_v19 = vpack.c.bf16 %v2746_v22, %v2745_v21 }
0x2e13   :  { %2599 = vperm.xlu1 %3685, %v2596_v25  }
0x2e17   :  { %2607 = vperm.xlu1 %3685, %v2604_v14  }
0x2e1b   :  { %2615 = vperm.xlu1 %3685, %v2612_v23  }
0x2e1f   :  { %2623 = vperm.xlu1 %3685, %v2620_v27  }
0x2e23   :  { %2631 = vperm.xlu1 %3685, %v2628_v2  }
0x2e27   :  { %2639 = vperm.xlu1 %3685, %v2636_v35  }
0x2e8e   :  { %v2585_v33 = vpop.permute.xlu1 %2584  ;;  %v2592_v44 = vpop.permute.xlu0 %2591 }
0x2e8f   :  { %v2594_v49 = vmul.f32 %v2592_v44, %v4227_v61  ;;  %v2587_v38 = vmul.f32 %v2585_v33, %v4175_v10  ;;  %v2733_v61 = vld [vmem:[%s4655_s12 + $0x10] sm:$0xff] }
0x2e91   :  { %v2595_v43 = vadd.f32 %v2594_v49, %v2587_v38 }
0x2e92   :  { %v2600_v34 = vpop.permute.xlu1 %2599 }
0x2e93   :  { %v2602_v36 = vmul.f32 %v2600_v34, %v4279_v56  ;;  %v3653_v56 = vpack.c.bf16 %v2732_v13, %v2731_v48 }
0x2e95   :  { %v2603_v10 = vadd.f32 %v2602_v36, %v2595_v43  ;;  %3654 = vmatpush3.bf16.msra.mxu0 %v3653_v56 }
0x2e96   :  { %v2608_v32 = vpop.permute.xlu1 %2607  ;;  %3655 = vmatprep.subr.bf16.mxu0 %v3924_v1 }
0x2e97   :  { %v2610_v39 = vmul.f32 %v2608_v32, %v4331_v53  ;;  %v2734_v53 = vld [vmem:[%s4655_s12 + $0x18] sm:$0xff] }
0x2e98   :  { %v3656_v50 = vpack.c.bf16 %v2734_v53, %v2733_v61 }
0x2e99   :  { %v2611_v55 = vadd.f32 %v2610_v39, %v2603_v10 }
0x2e9a   :  { %v2616_v41 = vpop.permute.xlu1 %2615  ;;  %3657 = vmatpush3.bf16.msra.mxu0 %v3656_v50 }
0x2e9b   :  { %v2618_v59 = vmul.f32 %v2616_v41, %v4382_v45  ;;  %v2736_v45 = vld [vmem:[%s4655_s12 + $0x28] sm:$0xff]  ;;  %3658 = vmatprep.subr.bf16.mxu0 %v3924_v1 }
0x2e9c   :  { %v3659_v6 = vpack.c.bf16 %v2736_v45, %v2735_v54 }
0x2e9d   :  { %v2619_v52 = vadd.f32 %v2618_v59, %v2611_v55 }
0x2e9e   :  { %v2624_v12 = vpop.permute.xlu1 %2623  ;;  %3660 = vmatpush3.bf16.msra.mxu0 %v3659_v6 }
0x2e9f   :  { %v2626_v31 = vmul.f32 %v2624_v12, %v4434_v46  ;;  %3661 = vmatprep.subr.bf16.mxu0 %v3924_v1 }
0x2ea1   :  { %v2627_v57 = vadd.f32 %v2626_v31, %v2619_v52 }
0x2ea2   :  { %v2632_v51 = vpop.permute.xlu1 %2631 }
0x2ea3   :  { %v2634_v58 = vmul.f32 %v2632_v51, %v4486_v42  ;;  %v3662_v42 = vpack.c.bf16 %v2738_v63, %v2737_v60 }
0x2ea5   :  { %v2635_v62 = vadd.f32 %v2634_v58, %v2627_v57  ;;  %3663 = vmatpush3.bf16.msra.mxu0 %v3662_v42 }
0x2ea6   :  { %v2640_v46 = vpop.permute.xlu1 %2639  ;;  %3664 = vmatprep.subr.bf16.mxu0 %v3924_v1 }
0x2ea7   :  { %v2642_v3 = vmul.f32 %v2640_v46, %v4536_v4  ;;  %v2741_v4 = vld [vmem:[%s4655_s12 + $0x50] sm:$0xff]  ;;  %s3894_s12 = scalar_lea.vmem %s2833_s20, 32 }
0x2ea8   :  { %v3668_v47 = vpack.c.bf16 %v2742_v0, %v2741_v4  ;;  %p3895_p2 = scmp.ne.s32.totalorder %s2833_s20, %s3894_s12  ;;  %p3900_p4 = scmp.lt.s32.totalorder %s3894_s12, %s3894_s12 }
0x2ea9   :  { %v2643_v5 = vadd.f32 %v2642_v3, %v2635_v62  ;;  %3666 = vmatpush3.bf16.msra.mxu0 %v3665_v8 }
0x2eaa   :  { %3667 = vmatprep.subr.bf16.mxu0 %v3924_v1  ;;  %p3901_p5 = por %p3900_p4, %p3899_p3 }
0x2eab   :  { %2656 = vrot.lane.b32.xlu1 %v2643_v5, %s3928_s3 }
0x2eac   :  { %p3902_p6 = pnand %p3901_p5, %p3895_p2 }
0x2ead   :  { %3669 = vmatpush3.bf16.msra.mxu0 %v3668_v47 }
0x2eae   :  { %3670 = vmatprep.subr.bf16.mxu0 %v3924_v1 }
0x2eb1   :  { %3672 = vmatpush3.bf16.msra.mxu0 %v3671_v15 }
0x2eb2   :  { %3673 = vmatprep.subr.bf16.mxu0 %v3924_v1  ;;  %v2890_v1 = vld [vmem:[%s4656_s13] ss:$0 sm:$0xff] }
0x2eb5   :  { %3675 = vmatpush3.bf16.msra.mxu0 %v3674_v19 }
0x2f1d   :  { %v2657_v17 = vpop.permute.xlu1 %2656 }
0x2f1e   :  { %3413 = vmatmul.mubr.msk.f32.vlgmr.msra.gmra.mrb[34].mxu1 %vm187_vm2, %v2657_v17 }
0x2ff1   :  { %v2726_v20 = vpop.f32.mrb[34].mxu1 }
0x2ff2   :  { %v2727_v24 = vadd.f32 %v2888_v18, %v2726_v20  ;;  %v3414_v25 = vpop.f32.mrb[35].mxu1 }
0x2ff4   :  { %v2730_v14 = vmax.f32 %v2727_v24, 0.0 }
0x2ff6   :  { %3448 = vmatmul.mubr.f32.vlgmr.msra.gmra.mrb[16].mxu0 %v2730_v14 }
0x30c9   :  { %v2820_v23 = vpop.f32.mrb[16].mxu0 }
0x30ca   :  { %v2821_v27 = vadd.f32 %v2890_v1, %v2820_v23  ;;  %v3449_v2 = vpop.f32.mrb[17].mxu0 }
0x30cc   :  { %2825 = vst.msk [vmem:[#allocation8] sm:$0x3] %vm2824_vm5, %v2821_v27 }
0x30cd   :  { %3905 = shalt.err (!%p3902_p6)
}
0x30ce   :  { %s3906_s2 = scalar_lea.hbm %s4657_s14, 32 }
0x30cf   :  { %p3907_p7 = scmp.ne.s32.totalorder %s4657_s14, %s3906_s2  ;;  %p3910_p8 = scmp.lt.u32.totalorder %s3906_s2, %s4657_s14 }
0x30d1   :  { %p3912_p9 = pnand %p3910_p8, %p3907_p7 }
0x30d3   :  { %3915 = shalt.err (!%p3912_p9)
}
0x30d4   :  { %2835 = dma.vmem_to_hbm [thread:$0]  %s2833_s20, 32, %s4657_s14, [#allocation5]  }
0x30d5   :  { %3920 = dma.done.wait [#allocation5], 32  }
0x30d6   :  { %3921 = vsyncadd [#allocation5], 4294967264 }
0x30d7   :  { %2839 = vsyncpa [#allocation4], 1 }
0x30d8   :  { %2840 = vsyncpa [#allocation7], 1 }
0x30d9   :  { %2841 = vsyncpa [#allocation5], 1 }

</bundles_post_ra>
